<compile_context>
chip_gen: v7x
topology: tpu7x:2x2x1
jax: 0.10.0
libtpu: 0.0.40
codegen_flags: <defaults>
</compile_context>

<pallas_src>
import numpy as np
import jax
import jax.numpy as jnp
from jax.experimental import pallas as pl
from jax.experimental.pallas import tpu as pltpu


def _round_up(n, m):
    return ((n + m - 1) // m) * m


# ------------------------------ fused kernel ------------------------------

def _make_film_kernel(group_meta, np_max):
    """group_meta: list of (G, M, kp, npd, col0, row0) per generator group."""
    n_groups = len(group_meta)

    def kernel(*refs):
        x_ref, w1_ref, aux_ref = refs[0], refs[1], refs[2]
        w2_refs = refs[3:3 + n_groups]                      # VMEM (auto-DMA)
        w3_hbm = refs[3 + n_groups:3 + 2 * n_groups]        # HBM (pl.ANY), manual DMA
        out_ref = refs[3 + 2 * n_groups]
        w3_vmem = refs[4 + 2 * n_groups:4 + 3 * n_groups]   # VMEM scratch
        sem = refs[4 + 3 * n_groups]                        # DMA semaphores

        # Kick off the w3 HBM->VMEM copies; they overlap with the layer-1/2
        # compute below (which only needs x / w1 / aux / w2 -- those were
        # auto-DMA'd by Pallas before the body started).
        copies = []
        for i in range(n_groups):
            cp = pltpu.make_async_copy(w3_hbm[i], w3_vmem[i], sem.at[i])
            cp.start()
            copies.append(cp)

        # Layer 1: ONE wide MXU matmul over all generators at once.
        x = x_ref[...].astype(jnp.bfloat16)                                   # (1, T)
        h1 = jnp.dot(x, w1_ref[...], preferred_element_type=jnp.float32)     # (1, L1) f32
        aux = aux_ref[...]          # (4, Gt, np_max) f32 ; rows: b1, b2, reg, c=b3*reg+off

        # Phase 1: per-generator layer-1 bias/ReLU + layer-2 (w3 DMAs in flight).
        h2k = []
        for gi, (G, M, kp, npd, col0, row0) in enumerate(group_meta):
            for g in range(G):      # small, fully unrolled at trace time
                gg = row0 + g
                col = col0 + g * npd                                          # 128-aligned
                h = jnp.maximum(h1[:, col:col + npd] + aux[0, gg:gg + 1, :npd], 0.0)
                h2 = jnp.dot(h[:, :kp].astype(jnp.bfloat16), w2_refs[gi][g],
                             preferred_element_type=jnp.float32)              # (1, npd)
                h2 = jnp.maximum(h2 + aux[1, gg:gg + 1, :npd], 0.0)
                h2k.append(h2[:, :kp].astype(jnp.bfloat16))

        # Phase 2: wait for each group's w3 copy, then layer-3 + folded output
        # affine, stored as lane-dense per-row vst's (no sublane concatenate).
        idx = 0
        for gi, (G, M, kp, npd, col0, row0) in enumerate(group_meta):
            copies[gi].wait()
            for g in range(G):
                gg = row0 + g
                y = jnp.dot(h2k[idx], w3_vmem[gi][g],
                            preferred_element_type=jnp.float32)               # (1, npd)
                out_ref[gg:gg + 1, :npd] = (y * aux[2, gg:gg + 1, :npd]
                                            + aux[3, gg:gg + 1, :npd])
                idx += 1

    return kernel


def build_film_forward(packed, group_meta, np_max, layer_rows, layer_meta, task_dim):
    n_groups = len(group_meta)
    g_total = sum(gm[0] for gm in group_meta)
    kernel = _make_film_kernel(group_meta, np_max)

    vmem_spec = pl.BlockSpec(memory_space=pltpu.MemorySpace.VMEM)
    hbm_spec = pl.BlockSpec(memory_space=pl.ANY)
    in_specs = [vmem_spec] * (3 + n_groups) + [hbm_spec] * n_groups

    scratch_shapes = [pltpu.VMEM(tuple(a.shape), jnp.bfloat16) for a in packed["w3"]]
    scratch_shapes.append(pltpu.SemaphoreType.DMA((n_groups,)))

    # VMEM footprint (VMEM-resident operands + w3 scratch + output) with headroom;
    # matters on v7x (64 MiB physical / 32 MiB scoped default).
    vmem_bytes = (packed["w1"].size * packed["w1"].dtype.itemsize
                  + packed["aux"].size * packed["aux"].dtype.itemsize
                  + sum(a.size * a.dtype.itemsize for a in packed["w2"])
                  + sum(a.size * a.dtype.itemsize for a in packed["w3"])
                  + g_total * np_max * 4 + task_dim * 4)
    vmem_limit = int(min(100 << 20, max(4 << 20, 2 * vmem_bytes)))

    film_call = pl.pallas_call(
        kernel,
        out_shape=jax.ShapeDtypeStruct((g_total, np_max), jnp.float32),
        in_specs=in_specs,
        out_specs=vmem_spec,
        scratch_shapes=scratch_shapes,
        compiler_params=pltpu.CompilerParams(vmem_limit_bytes=vmem_limit),
    )

    def forward(x):
        out = film_call(x, packed["w1"], packed["aux"], *packed["w2"], *packed["w3"])
        result = []
        for (num_maps, num_blocks), rows in zip(layer_meta, layer_rows):
            blocks = []
            for b in range(num_blocks):
                blocks.append({
                    "gamma": out[rows[b], :num_maps],                # squeeze(): (num_maps,)
                    "beta": out[rows[num_blocks + b], :num_maps],    # squeeze(): (num_maps,)
                })
            result.append(blocks)
        return result

    return forward


# ------------------------ parameter construction (glue) ------------------------

def _linear_init(key, fan_in, fan_out):
    # Deterministic stand-in for nn.Linear default init (uniform +/- 1/sqrt(fan_in)).
    kw, kb = jax.random.split(key)
    bound = 1.0 / (fan_in ** 0.5)
    w = jax.random.uniform(kw, (fan_in, fan_out), jnp.float32, -bound, bound)
    b = jax.random.uniform(kb, (fan_out,), jnp.float32, -bound, bound)
    return w, b


def make_film_adapter_params(key, num_maps_per_layer, num_blocks_per_layer, task_dim):
    """Per-layer stacked generator weights (gamma generators first, then beta)."""
    layers = []
    for num_maps, num_blocks in zip(num_maps_per_layer, num_blocks_per_layer):
        G = 2 * num_blocks
        w1s, b1s, w2s, b2s, w3s, b3s, regs, offs = [], [], [], [], [], [], [], []
        for g in range(G):
            key, k1, k2, k3, kr = jax.random.split(key, 5)
            w1, b1 = _linear_init(k1, task_dim, num_maps)
            w2, b2 = _linear_init(k2, num_maps, num_maps)
            w3, b3 = _linear_init(k3, num_maps, num_maps)
            reg = 0.001 * jax.random.normal(kr, (num_maps,), jnp.float32)
            off = jnp.full((num_maps,), 1.0 if g < num_blocks else 0.0, jnp.float32)
            w1s.append(w1); b1s.append(b1); w2s.append(w2); b2s.append(b2)
            w3s.append(w3); b3s.append(b3); regs.append(reg); offs.append(off)
        layers.append({
            "w1": jnp.stack(w1s), "b1": jnp.stack(b1s),
            "w2": jnp.stack(w2s), "b2": jnp.stack(b2s),
            "w3": jnp.stack(w3s), "b3": jnp.stack(b3s),
            "reg": jnp.stack(regs), "off": jnp.stack(offs),
        })
    return layers


def pack_params_for_kernel(layer_params, task_dim):
    """Groups generators by their own num_maps, pads each group independently
    (lane/N dim to 128, contraction/K dim to the bf16 sublane tile of 16),
    lane-packs all layer-1 weights into one slab, merges the small f32 operands
    into one 'aux' array and folds the output affine (c = b3*reg + off).
    All padding is exact zeros and never contaminates real outputs."""
    T = task_dim

    group_Ms, members = [], {}               # M -> list of (layer_idx, gen_idx)
    for li, p in enumerate(layer_params):
        G, _, M = p["w1"].shape
        if M not in members:
            members[M] = []
            group_Ms.append(M)
        for g in range(G):
            members[M].append((li, g))

    np_max = max(_round_up(M, 128) for M in group_Ms)
    g_total = sum(len(members[M]) for M in group_Ms)

    group_meta, col0, row0 = [], 0, 0        # (G, M, kp, npd, col0, row0)
    for M in group_Ms:
        G = len(members[M])
        kp = _round_up(M, 16)                # bf16 sublane tile on contraction dim
        npd = _round_up(M, 128)              # lane-dense output dim
        group_meta.append((G, M, kp, npd, col0, row0))
        col0 += G * npd
        row0 += G
    L1 = col0

    w1 = np.zeros((T, L1), np.float32)
    aux = np.zeros((4, g_total, np_max), np.float32)   # rows: b1, b2, reg, c=b3*reg+off
    w2 = [np.zeros((gm[0], gm[2], gm[3]), np.float32) for gm in group_meta]
    w3 = [np.zeros((gm[0], gm[2], gm[3]), np.float32) for gm in group_meta]

    gen_row = {}
    for gi, M in enumerate(group_Ms):
        G, _, kp, npd, c0, r0 = group_meta[gi]
        for idx, (li, g) in enumerate(members[M]):
            p = layer_params[li]
            gg = r0 + idx
            col = c0 + idx * npd
            gen_row[(li, g)] = gg
            w1[:, col:col + M] = np.asarray(p["w1"][g], np.float32)
            aux[0, gg, :M] = np.asarray(p["b1"][g], np.float32)
            aux[1, gg, :M] = np.asarray(p["b2"][g], np.float32)
            reg = np.asarray(p["reg"][g], np.float32)
            aux[2, gg, :M] = reg
            aux[3, gg, :M] = (np.asarray(p["b3"][g], np.float32) * reg
                              + np.asarray(p["off"][g], np.float32))
            w2[gi][idx, :M, :M] = np.asarray(p["w2"][g], np.float32)
            w3[gi][idx, :M, :M] = np.asarray(p["w3"][g], np.float32)

    packed = {
        "w1": jnp.asarray(w1, jnp.bfloat16),
        "aux": jnp.asarray(aux, jnp.float32),
        "w2": [jnp.asarray(a, jnp.bfloat16) for a in w2],
        "w3": [jnp.asarray(a, jnp.bfloat16) for a in w3],
    }
    layer_rows = []
    for li, p in enumerate(layer_params):
        G = p["w1"].shape[0]
        layer_rows.append([gen_row[(li, g)] for g in range(G)])
    return packed, group_meta, np_max, layer_rows


class FilmAdapterPallas:
    """JAX/Pallas equivalent of FilmAdapter (FilmLayerGenerator variant)."""
    # TODO(synk): the x-independent FilmLayer ('learn') variant and
    # regularization_term() have no forward compute hot path and are not
    # reimplemented here; only the generator forward is.

    def __init__(self, adaptation_config, task_dim, key):
        self.num_maps = adaptation_config["num_maps_per_layer"]
        self.num_blocks = adaptation_config["num_blocks_per_layer"]
        self.task_dim = task_dim
        self.num_target_layers = len(self.num_maps)
        self.layer_params = make_film_adapter_params(
            key, self.num_maps, self.num_blocks, task_dim)
        packed, group_meta, np_max, layer_rows = pack_params_for_kernel(
            self.layer_params, task_dim)
        self.packed = packed
        self.layer_meta = list(zip(self.num_maps, self.num_blocks))
        self._forward = jax.jit(build_film_forward(
            packed, group_meta, np_max, layer_rows, self.layer_meta, task_dim))

    def __call__(self, x):
        return self._forward(x)


# ------------------------------- reference check -------------------------------

def _reference_layer(x, p):
    """Pure-JAX reference with the module semantics, using the same bf16 weight /
    bf16 activation rounding and f32 accumulation as the kernel."""
    bf = jnp.bfloat16
    G = p["w1"].shape[0]
    nb = G // 2
    xb = x.astype(bf)
    outs = []
    for g in range(G):
        h = jnp.dot(xb, p["w1"][g].astype(bf), preferred_element_type=jnp.float32) + p["b1"][g]
        h = jnp.maximum(h, 0.0)
        h = jnp.dot(h.astype(bf), p["w2"][g].astype(bf), preferred_element_type=jnp.float32) + p["b2"][g]
        h = jnp.maximum(h, 0.0)
        y = jnp.dot(h.astype(bf), p["w3"][g].astype(bf), preferred_element_type=jnp.float32) + p["b3"][g]
        outs.append((y * p["reg"][g] + p["off"][g])[0])
    return [{"gamma": outs[b], "beta": outs[nb + b]} for b in range(nb)]


if __name__ == "__main__":
    key = jax.random.PRNGKey(0)
    k_param, k_x = jax.random.split(key)

    task_dim = 32
    adaptation_config = {
        "num_maps_per_layer": [64, 128],
        "num_blocks_per_layer": [2, 2],
    }

    adapter = FilmAdapterPallas(adaptation_config, task_dim, k_param)

    x = jax.random.normal(k_x, (1, task_dim), jnp.float32)  # task embedding

    out = adapter(x)
    out = jax.block_until_ready(out)

    # correctness vs. pure-JAX reference (same bf16 weight rounding)
    for layer_out, p in zip(out, adapter.layer_params):
        ref = _reference_layer(x, p)
        for got, exp in zip(layer_out, ref):
            assert jnp.allclose(got["gamma"], exp["gamma"], rtol=1e-3, atol=1e-3)
            assert jnp.allclose(got["beta"], exp["beta"], rtol=1e-3, atol=1e-3)

    print("KERNEL_OK")
</pallas_src>

<mosaic_0001>
module attributes {stable_mosaic.version = 11 : i64} {
  func.func @kernel(%arg0: memref<1x32xf32, #tpu.memory_space<vmem>>, %arg1: memref<32x1024xbf16, #tpu.memory_space<vmem>>, %arg2: memref<4x8x128xf32, #tpu.memory_space<vmem>>, %arg3: memref<4x64x128xbf16, #tpu.memory_space<vmem>>, %arg4: memref<4x128x128xbf16, #tpu.memory_space<vmem>>, %arg5: memref<4x64x128xbf16, #tpu.memory_space<any>>, %arg6: memref<4x128x128xbf16, #tpu.memory_space<any>>, %arg7: memref<8x128xf32, #tpu.memory_space<vmem>>, %arg8: memref<4x64x128xbf16, #tpu.memory_space<vmem>>, %arg9: memref<4x128x128xbf16, #tpu.memory_space<vmem>>, %arg10: memref<2x!tpu.dma_semaphore, #tpu.memory_space<semaphore_mem>>) attributes {dimension_semantics = [], scalar_prefetch = 0 : i64, scratch_operands = 3 : i64, tpu.core_type = #tpu.core_type<tc>} {
    %c0_i32 = arith.constant 0 : i32
    %0 = tpu.memref_slice %arg10[%c0_i32] : memref<2x!tpu.dma_semaphore, #tpu.memory_space<semaphore_mem>> -> memref<1x!tpu.dma_semaphore, #tpu.memory_space<semaphore_mem>>
    %1 = tpu.memref_squeeze %0 : memref<1x!tpu.dma_semaphore, #tpu.memory_space<semaphore_mem>> -> memref<!tpu.dma_semaphore, #tpu.memory_space<semaphore_mem>>
    tpu.enqueue_dma source(%arg5 : memref<4x64x128xbf16, #tpu.memory_space<any>>) target(%arg8 : memref<4x64x128xbf16, #tpu.memory_space<vmem>>) target_semaphore(%1 : memref<!tpu.dma_semaphore, #tpu.memory_space<semaphore_mem>>)
    %c1_i32 = arith.constant 1 : i32
    %2 = tpu.memref_slice %arg10[%c1_i32] : memref<2x!tpu.dma_semaphore, #tpu.memory_space<semaphore_mem>> -> memref<1x!tpu.dma_semaphore, #tpu.memory_space<semaphore_mem>>
    %3 = tpu.memref_squeeze %2 : memref<1x!tpu.dma_semaphore, #tpu.memory_space<semaphore_mem>> -> memref<!tpu.dma_semaphore, #tpu.memory_space<semaphore_mem>>
    tpu.enqueue_dma source(%arg6 : memref<4x128x128xbf16, #tpu.memory_space<any>>) target(%arg9 : memref<4x128x128xbf16, #tpu.memory_space<vmem>>) target_semaphore(%3 : memref<!tpu.dma_semaphore, #tpu.memory_space<semaphore_mem>>)
    %c0 = arith.constant 0 : index
    %c0_0 = arith.constant 0 : index
    %4 = vector.load %arg0[%c0, %c0_0] : memref<1x32xf32, #tpu.memory_space<vmem>>, vector<1x32xf32>
    %5 = arith.truncf %4 : vector<1x32xf32> to vector<1x32xbf16>
    %c0_1 = arith.constant 0 : index
    %c0_2 = arith.constant 0 : index
    %6 = vector.load %arg1[%c0_1, %c0_2] : memref<32x1024xbf16, #tpu.memory_space<vmem>>, vector<32x1024xbf16>
    %cst = arith.constant dense<0.000000e+00> : vector<1x1024xf32>
    %7 = tpu.matmul %5, %6, %cst {dimension_numbers = #tpu.dot_dimension_numbers<[1], [0], [0], [1], [0, 0, 1, 1], [], []>} : vector<1x32xbf16>, vector<32x1024xbf16>, vector<1x1024xf32> -> vector<1x1024xf32>
    %c0_3 = arith.constant 0 : index
    %c0_4 = arith.constant 0 : index
    %c0_5 = arith.constant 0 : index
    %8 = vector.load %arg2[%c0_3, %c0_4, %c0_5] : memref<4x8x128xf32, #tpu.memory_space<vmem>>, vector<4x8x128xf32>
    %9 = vector.extract_strided_slice %7 {offsets = [0, 0], sizes = [1, 128], strides = [1, 1]} : vector<1x1024xf32> to vector<1x128xf32>
    %10 = vector.extract_strided_slice %8 {offsets = [0, 0, 0], sizes = [1, 1, 128], strides = [1, 1, 1]} : vector<4x8x128xf32> to vector<1x1x128xf32>
    %11 = vector.shape_cast %10 : vector<1x1x128xf32> to vector<1x128xf32>
    %12 = arith.addf %9, %11 : vector<1x128xf32>
    %cst_6 = arith.constant 0.000000e+00 : f32
    %13 = vector.broadcast %cst_6 : f32 to vector<1x128xf32>
    %14 = arith.maximumf %12, %13 : vector<1x128xf32>
    %15 = vector.extract_strided_slice %14 {offsets = [0, 0], sizes = [1, 64], strides = [1, 1]} : vector<1x128xf32> to vector<1x64xf32>
    %16 = arith.truncf %15 : vector<1x64xf32> to vector<1x64xbf16>
    %c0_7 = arith.constant 0 : index
    %c0_8 = arith.constant 0 : index
    %c0_9 = arith.constant 0 : index
    %17 = vector.load %arg3[%c0_7, %c0_8, %c0_9] : memref<4x64x128xbf16, #tpu.memory_space<vmem>>, vector<1x64x128xbf16>
    %18 = vector.shape_cast %17 : vector<1x64x128xbf16> to vector<64x128xbf16>
    %cst_10 = arith.constant dense<0.000000e+00> : vector<1x128xf32>
    %19 = tpu.matmul %16, %18, %cst_10 {dimension_numbers = #tpu.dot_dimension_numbers<[1], [0], [0], [1], [0, 0, 1, 1], [], []>} : vector<1x64xbf16>, vector<64x128xbf16>, vector<1x128xf32> -> vector<1x128xf32>
    %20 = vector.extract_strided_slice %8 {offsets = [1, 0, 0], sizes = [1, 1, 128], strides = [1, 1, 1]} : vector<4x8x128xf32> to vector<1x1x128xf32>
    %21 = vector.shape_cast %20 : vector<1x1x128xf32> to vector<1x128xf32>
    %22 = arith.addf %19, %21 : vector<1x128xf32>
    %cst_11 = arith.constant 0.000000e+00 : f32
    %23 = vector.broadcast %cst_11 : f32 to vector<1x128xf32>
    %24 = arith.maximumf %22, %23 : vector<1x128xf32>
    %25 = vector.extract_strided_slice %24 {offsets = [0, 0], sizes = [1, 64], strides = [1, 1]} : vector<1x128xf32> to vector<1x64xf32>
    %26 = arith.truncf %25 : vector<1x64xf32> to vector<1x64xbf16>
    %27 = vector.extract_strided_slice %7 {offsets = [0, 128], sizes = [1, 128], strides = [1, 1]} : vector<1x1024xf32> to vector<1x128xf32>
    %28 = vector.extract_strided_slice %8 {offsets = [0, 1, 0], sizes = [1, 1, 128], strides = [1, 1, 1]} : vector<4x8x128xf32> to vector<1x1x128xf32>
    %29 = vector.shape_cast %28 : vector<1x1x128xf32> to vector<1x128xf32>
    %30 = arith.addf %27, %29 : vector<1x128xf32>
    %cst_12 = arith.constant 0.000000e+00 : f32
    %31 = vector.broadcast %cst_12 : f32 to vector<1x128xf32>
    %32 = arith.maximumf %30, %31 : vector<1x128xf32>
    %33 = vector.extract_strided_slice %32 {offsets = [0, 0], sizes = [1, 64], strides = [1, 1]} : vector<1x128xf32> to vector<1x64xf32>
    %34 = arith.truncf %33 : vector<1x64xf32> to vector<1x64xbf16>
    %c1 = arith.constant 1 : index
    %c0_13 = arith.constant 0 : index
    %c0_14 = arith.constant 0 : index
    %35 = vector.load %arg3[%c1, %c0_13, %c0_14] : memref<4x64x128xbf16, #tpu.memory_space<vmem>>, vector<1x64x128xbf16>
    %36 = vector.shape_cast %35 : vector<1x64x128xbf16> to vector<64x128xbf16>
    %cst_15 = arith.constant dense<0.000000e+00> : vector<1x128xf32>
    %37 = tpu.matmul %34, %36, %cst_15 {dimension_numbers = #tpu.dot_dimension_numbers<[1], [0], [0], [1], [0, 0, 1, 1], [], []>} : vector<1x64xbf16>, vector<64x128xbf16>, vector<1x128xf32> -> vector<1x128xf32>
    %38 = vector.extract_strided_slice %8 {offsets = [1, 1, 0], sizes = [1, 1, 128], strides = [1, 1, 1]} : vector<4x8x128xf32> to vector<1x1x128xf32>
    %39 = vector.shape_cast %38 : vector<1x1x128xf32> to vector<1x128xf32>
    %40 = arith.addf %37, %39 : vector<1x128xf32>
    %cst_16 = arith.constant 0.000000e+00 : f32
    %41 = vector.broadcast %cst_16 : f32 to vector<1x128xf32>
    %42 = arith.maximumf %40, %41 : vector<1x128xf32>
    %43 = vector.extract_strided_slice %42 {offsets = [0, 0], sizes = [1, 64], strides = [1, 1]} : vector<1x128xf32> to vector<1x64xf32>
    %44 = arith.truncf %43 : vector<1x64xf32> to vector<1x64xbf16>
    %45 = vector.extract_strided_slice %7 {offsets = [0, 256], sizes = [1, 128], strides = [1, 1]} : vector<1x1024xf32> to vector<1x128xf32>
    %46 = vector.extract_strided_slice %8 {offsets = [0, 2, 0], sizes = [1, 1, 128], strides = [1, 1, 1]} : vector<4x8x128xf32> to vector<1x1x128xf32>
    %47 = vector.shape_cast %46 : vector<1x1x128xf32> to vector<1x128xf32>
    %48 = arith.addf %45, %47 : vector<1x128xf32>
    %cst_17 = arith.constant 0.000000e+00 : f32
    %49 = vector.broadcast %cst_17 : f32 to vector<1x128xf32>
    %50 = arith.maximumf %48, %49 : vector<1x128xf32>
    %51 = vector.extract_strided_slice %50 {offsets = [0, 0], sizes = [1, 64], strides = [1, 1]} : vector<1x128xf32> to vector<1x64xf32>
    %52 = arith.truncf %51 : vector<1x64xf32> to vector<1x64xbf16>
    %c2 = arith.constant 2 : index
    %c0_18 = arith.constant 0 : index
    %c0_19 = arith.constant 0 : index
    %53 = vector.load %arg3[%c2, %c0_18, %c0_19] : memref<4x64x128xbf16, #tpu.memory_space<vmem>>, vector<1x64x128xbf16>
    %54 = vector.shape_cast %53 : vector<1x64x128xbf16> to vector<64x128xbf16>
    %cst_20 = arith.constant dense<0.000000e+00> : vector<1x128xf32>
    %55 = tpu.matmul %52, %54, %cst_20 {dimension_numbers = #tpu.dot_dimension_numbers<[1], [0], [0], [1], [0, 0, 1, 1], [], []>} : vector<1x64xbf16>, vector<64x128xbf16>, vector<1x128xf32> -> vector<1x128xf32>
    %56 = vector.extract_strided_slice %8 {offsets = [1, 2, 0], sizes = [1, 1, 128], strides = [1, 1, 1]} : vector<4x8x128xf32> to vector<1x1x128xf32>
    %57 = vector.shape_cast %56 : vector<1x1x128xf32> to vector<1x128xf32>
    %58 = arith.addf %55, %57 : vector<1x128xf32>
    %cst_21 = arith.constant 0.000000e+00 : f32
    %59 = vector.broadcast %cst_21 : f32 to vector<1x128xf32>
    %60 = arith.maximumf %58, %59 : vector<1x128xf32>
    %61 = vector.extract_strided_slice %60 {offsets = [0, 0], sizes = [1, 64], strides = [1, 1]} : vector<1x128xf32> to vector<1x64xf32>
    %62 = arith.truncf %61 : vector<1x64xf32> to vector<1x64xbf16>
    %63 = vector.extract_strided_slice %7 {offsets = [0, 384], sizes = [1, 128], strides = [1, 1]} : vector<1x1024xf32> to vector<1x128xf32>
    %64 = vector.extract_strided_slice %8 {offsets = [0, 3, 0], sizes = [1, 1, 128], strides = [1, 1, 1]} : vector<4x8x128xf32> to vector<1x1x128xf32>
    %65 = vector.shape_cast %64 : vector<1x1x128xf32> to vector<1x128xf32>
    %66 = arith.addf %63, %65 : vector<1x128xf32>
    %cst_22 = arith.constant 0.000000e+00 : f32
    %67 = vector.broadcast %cst_22 : f32 to vector<1x128xf32>
    %68 = arith.maximumf %66, %67 : vector<1x128xf32>
    %69 = vector.extract_strided_slice %68 {offsets = [0, 0], sizes = [1, 64], strides = [1, 1]} : vector<1x128xf32> to vector<1x64xf32>
    %70 = arith.truncf %69 : vector<1x64xf32> to vector<1x64xbf16>
    %c3 = arith.constant 3 : index
    %c0_23 = arith.constant 0 : index
    %c0_24 = arith.constant 0 : index
    %71 = vector.load %arg3[%c3, %c0_23, %c0_24] : memref<4x64x128xbf16, #tpu.memory_space<vmem>>, vector<1x64x128xbf16>
    %72 = vector.shape_cast %71 : vector<1x64x128xbf16> to vector<64x128xbf16>
    %cst_25 = arith.constant dense<0.000000e+00> : vector<1x128xf32>
    %73 = tpu.matmul %70, %72, %cst_25 {dimension_numbers = #tpu.dot_dimension_numbers<[1], [0], [0], [1], [0, 0, 1, 1], [], []>} : vector<1x64xbf16>, vector<64x128xbf16>, vector<1x128xf32> -> vector<1x128xf32>
    %74 = vector.extract_strided_slice %8 {offsets = [1, 3, 0], sizes = [1, 1, 128], strides = [1, 1, 1]} : vector<4x8x128xf32> to vector<1x1x128xf32>
    %75 = vector.shape_cast %74 : vector<1x1x128xf32> to vector<1x128xf32>
    %76 = arith.addf %73, %75 : vector<1x128xf32>
    %cst_26 = arith.constant 0.000000e+00 : f32
    %77 = vector.broadcast %cst_26 : f32 to vector<1x128xf32>
    %78 = arith.maximumf %76, %77 : vector<1x128xf32>
    %79 = vector.extract_strided_slice %78 {offsets = [0, 0], sizes = [1, 64], strides = [1, 1]} : vector<1x128xf32> to vector<1x64xf32>
    %80 = arith.truncf %79 : vector<1x64xf32> to vector<1x64xbf16>
    %81 = vector.extract_strided_slice %7 {offsets = [0, 512], sizes = [1, 128], strides = [1, 1]} : vector<1x1024xf32> to vector<1x128xf32>
    %82 = vector.extract_strided_slice %8 {offsets = [0, 4, 0], sizes = [1, 1, 128], strides = [1, 1, 1]} : vector<4x8x128xf32> to vector<1x1x128xf32>
    %83 = vector.shape_cast %82 : vector<1x1x128xf32> to vector<1x128xf32>
    %84 = arith.addf %81, %83 : vector<1x128xf32>
    %cst_27 = arith.constant 0.000000e+00 : f32
    %85 = vector.broadcast %cst_27 : f32 to vector<1x128xf32>
    %86 = arith.maximumf %84, %85 : vector<1x128xf32>
    %87 = arith.truncf %86 : vector<1x128xf32> to vector<1x128xbf16>
    %c0_28 = arith.constant 0 : index
    %c0_29 = arith.constant 0 : index
    %c0_30 = arith.constant 0 : index
    %88 = vector.load %arg4[%c0_28, %c0_29, %c0_30] : memref<4x128x128xbf16, #tpu.memory_space<vmem>>, vector<1x128x128xbf16>
    %89 = vector.shape_cast %88 : vector<1x128x128xbf16> to vector<128x128xbf16>
    %cst_31 = arith.constant dense<0.000000e+00> : vector<1x128xf32>
    %90 = tpu.matmul %87, %89, %cst_31 {dimension_numbers = #tpu.dot_dimension_numbers<[1], [0], [0], [1], [0, 0, 1, 1], [], []>} : vector<1x128xbf16>, vector<128x128xbf16>, vector<1x128xf32> -> vector<1x128xf32>
    %91 = vector.extract_strided_slice %8 {offsets = [1, 4, 0], sizes = [1, 1, 128], strides = [1, 1, 1]} : vector<4x8x128xf32> to vector<1x1x128xf32>
    %92 = vector.shape_cast %91 : vector<1x1x128xf32> to vector<1x128xf32>
    %93 = arith.addf %90, %92 : vector<1x128xf32>
    %cst_32 = arith.constant 0.000000e+00 : f32
    %94 = vector.broadcast %cst_32 : f32 to vector<1x128xf32>
    %95 = arith.maximumf %93, %94 : vector<1x128xf32>
    %96 = arith.truncf %95 : vector<1x128xf32> to vector<1x128xbf16>
    %97 = vector.extract_strided_slice %7 {offsets = [0, 640], sizes = [1, 128], strides = [1, 1]} : vector<1x1024xf32> to vector<1x128xf32>
    %98 = vector.extract_strided_slice %8 {offsets = [0, 5, 0], sizes = [1, 1, 128], strides = [1, 1, 1]} : vector<4x8x128xf32> to vector<1x1x128xf32>
    %99 = vector.shape_cast %98 : vector<1x1x128xf32> to vector<1x128xf32>
    %100 = arith.addf %97, %99 : vector<1x128xf32>
    %cst_33 = arith.constant 0.000000e+00 : f32
    %101 = vector.broadcast %cst_33 : f32 to vector<1x128xf32>
    %102 = arith.maximumf %100, %101 : vector<1x128xf32>
    %103 = arith.truncf %102 : vector<1x128xf32> to vector<1x128xbf16>
    %c1_34 = arith.constant 1 : index
    %c0_35 = arith.constant 0 : index
    %c0_36 = arith.constant 0 : index
    %104 = vector.load %arg4[%c1_34, %c0_35, %c0_36] : memref<4x128x128xbf16, #tpu.memory_space<vmem>>, vector<1x128x128xbf16>
    %105 = vector.shape_cast %104 : vector<1x128x128xbf16> to vector<128x128xbf16>
    %cst_37 = arith.constant dense<0.000000e+00> : vector<1x128xf32>
    %106 = tpu.matmul %103, %105, %cst_37 {dimension_numbers = #tpu.dot_dimension_numbers<[1], [0], [0], [1], [0, 0, 1, 1], [], []>} : vector<1x128xbf16>, vector<128x128xbf16>, vector<1x128xf32> -> vector<1x128xf32>
    %107 = vector.extract_strided_slice %8 {offsets = [1, 5, 0], sizes = [1, 1, 128], strides = [1, 1, 1]} : vector<4x8x128xf32> to vector<1x1x128xf32>
    %108 = vector.shape_cast %107 : vector<1x1x128xf32> to vector<1x128xf32>
    %109 = arith.addf %106, %108 : vector<1x128xf32>
    %cst_38 = arith.constant 0.000000e+00 : f32
    %110 = vector.broadcast %cst_38 : f32 to vector<1x128xf32>
    %111 = arith.maximumf %109, %110 : vector<1x128xf32>
    %112 = arith.truncf %111 : vector<1x128xf32> to vector<1x128xbf16>
    %113 = vector.extract_strided_slice %7 {offsets = [0, 768], sizes = [1, 128], strides = [1, 1]} : vector<1x1024xf32> to vector<1x128xf32>
    %114 = vector.extract_strided_slice %8 {offsets = [0, 6, 0], sizes = [1, 1, 128], strides = [1, 1, 1]} : vector<4x8x128xf32> to vector<1x1x128xf32>
    %115 = vector.shape_cast %114 : vector<1x1x128xf32> to vector<1x128xf32>
    %116 = arith.addf %113, %115 : vector<1x128xf32>
    %cst_39 = arith.constant 0.000000e+00 : f32
    %117 = vector.broadcast %cst_39 : f32 to vector<1x128xf32>
    %118 = arith.maximumf %116, %117 : vector<1x128xf32>
    %119 = arith.truncf %118 : vector<1x128xf32> to vector<1x128xbf16>
    %c2_40 = arith.constant 2 : index
    %c0_41 = arith.constant 0 : index
    %c0_42 = arith.constant 0 : index
    %120 = vector.load %arg4[%c2_40, %c0_41, %c0_42] : memref<4x128x128xbf16, #tpu.memory_space<vmem>>, vector<1x128x128xbf16>
    %121 = vector.shape_cast %120 : vector<1x128x128xbf16> to vector<128x128xbf16>
    %cst_43 = arith.constant dense<0.000000e+00> : vector<1x128xf32>
    %122 = tpu.matmul %119, %121, %cst_43 {dimension_numbers = #tpu.dot_dimension_numbers<[1], [0], [0], [1], [0, 0, 1, 1], [], []>} : vector<1x128xbf16>, vector<128x128xbf16>, vector<1x128xf32> -> vector<1x128xf32>
    %123 = vector.extract_strided_slice %8 {offsets = [1, 6, 0], sizes = [1, 1, 128], strides = [1, 1, 1]} : vector<4x8x128xf32> to vector<1x1x128xf32>
    %124 = vector.shape_cast %123 : vector<1x1x128xf32> to vector<1x128xf32>
    %125 = arith.addf %122, %124 : vector<1x128xf32>
    %cst_44 = arith.constant 0.000000e+00 : f32
    %126 = vector.broadcast %cst_44 : f32 to vector<1x128xf32>
    %127 = arith.maximumf %125, %126 : vector<1x128xf32>
    %128 = arith.truncf %127 : vector<1x128xf32> to vector<1x128xbf16>
    %129 = vector.extract_strided_slice %7 {offsets = [0, 896], sizes = [1, 128], strides = [1, 1]} : vector<1x1024xf32> to vector<1x128xf32>
    %130 = vector.extract_strided_slice %8 {offsets = [0, 7, 0], sizes = [1, 1, 128], strides = [1, 1, 1]} : vector<4x8x128xf32> to vector<1x1x128xf32>
    %131 = vector.shape_cast %130 : vector<1x1x128xf32> to vector<1x128xf32>
    %132 = arith.addf %129, %131 : vector<1x128xf32>
    %cst_45 = arith.constant 0.000000e+00 : f32
    %133 = vector.broadcast %cst_45 : f32 to vector<1x128xf32>
    %134 = arith.maximumf %132, %133 : vector<1x128xf32>
    %135 = arith.truncf %134 : vector<1x128xf32> to vector<1x128xbf16>
    %c3_46 = arith.constant 3 : index
    %c0_47 = arith.constant 0 : index
    %c0_48 = arith.constant 0 : index
    %136 = vector.load %arg4[%c3_46, %c0_47, %c0_48] : memref<4x128x128xbf16, #tpu.memory_space<vmem>>, vector<1x128x128xbf16>
    %137 = vector.shape_cast %136 : vector<1x128x128xbf16> to vector<128x128xbf16>
    %cst_49 = arith.constant dense<0.000000e+00> : vector<1x128xf32>
    %138 = tpu.matmul %135, %137, %cst_49 {dimension_numbers = #tpu.dot_dimension_numbers<[1], [0], [0], [1], [0, 0, 1, 1], [], []>} : vector<1x128xbf16>, vector<128x128xbf16>, vector<1x128xf32> -> vector<1x128xf32>
    %139 = vector.extract_strided_slice %8 {offsets = [1, 7, 0], sizes = [1, 1, 128], strides = [1, 1, 1]} : vector<4x8x128xf32> to vector<1x1x128xf32>
    %140 = vector.shape_cast %139 : vector<1x1x128xf32> to vector<1x128xf32>
    %141 = arith.addf %138, %140 : vector<1x128xf32>
    %cst_50 = arith.constant 0.000000e+00 : f32
    %142 = vector.broadcast %cst_50 : f32 to vector<1x128xf32>
    %143 = arith.maximumf %141, %142 : vector<1x128xf32>
    %144 = arith.truncf %143 : vector<1x128xf32> to vector<1x128xbf16>
    %c0_i32_51 = arith.constant 0 : i32
    %145 = tpu.memref_slice %arg10[%c0_i32_51] : memref<2x!tpu.dma_semaphore, #tpu.memory_space<semaphore_mem>> -> memref<1x!tpu.dma_semaphore, #tpu.memory_space<semaphore_mem>>
    %146 = tpu.memref_squeeze %145 : memref<1x!tpu.dma_semaphore, #tpu.memory_space<semaphore_mem>> -> memref<!tpu.dma_semaphore, #tpu.memory_space<semaphore_mem>>
    tpu.wait_dma2 semaphore(%146 : memref<!tpu.dma_semaphore, #tpu.memory_space<semaphore_mem>>) src(%arg5 : memref<4x64x128xbf16, #tpu.memory_space<any>>) dst(%arg8 : memref<4x64x128xbf16, #tpu.memory_space<vmem>>)
    %c0_52 = arith.constant 0 : index
    %c0_53 = arith.constant 0 : index
    %c0_54 = arith.constant 0 : index
    %147 = vector.load %arg8[%c0_52, %c0_53, %c0_54] : memref<4x64x128xbf16, #tpu.memory_space<vmem>>, vector<1x64x128xbf16>
    %148 = vector.shape_cast %147 : vector<1x64x128xbf16> to vector<64x128xbf16>
    %cst_55 = arith.constant dense<0.000000e+00> : vector<1x128xf32>
    %149 = tpu.matmul %26, %148, %cst_55 {dimension_numbers = #tpu.dot_dimension_numbers<[1], [0], [0], [1], [0, 0, 1, 1], [], []>} : vector<1x64xbf16>, vector<64x128xbf16>, vector<1x128xf32> -> vector<1x128xf32>
    %150 = vector.extract_strided_slice %8 {offsets = [2, 0, 0], sizes = [1, 1, 128], strides = [1, 1, 1]} : vector<4x8x128xf32> to vector<1x1x128xf32>
    %151 = vector.shape_cast %150 : vector<1x1x128xf32> to vector<1x128xf32>
    %152 = arith.mulf %149, %151 : vector<1x128xf32>
    %153 = vector.extract_strided_slice %8 {offsets = [3, 0, 0], sizes = [1, 1, 128], strides = [1, 1, 1]} : vector<4x8x128xf32> to vector<1x1x128xf32>
    %154 = vector.shape_cast %153 : vector<1x1x128xf32> to vector<1x128xf32>
    %155 = arith.addf %152, %154 : vector<1x128xf32>
    %c0_56 = arith.constant 0 : index
    %c0_57 = arith.constant 0 : index
    %156 = vector.load %arg7[%c0_56, %c0_57] : memref<8x128xf32, #tpu.memory_space<vmem>>, vector<1x128xf32>
    tpu.vector_store %arg7[%c0_56, %c0_57], %155 {strides = array<i32>} : memref<8x128xf32, #tpu.memory_space<vmem>>, vector<1x128xf32>,
    %c1_58 = arith.constant 1 : index
    %c0_59 = arith.constant 0 : index
    %c0_60 = arith.constant 0 : index
    %157 = vector.load %arg8[%c1_58, %c0_59, %c0_60] : memref<4x64x128xbf16, #tpu.memory_space<vmem>>, vector<1x64x128xbf16>
    %158 = vector.shape_cast %157 : vector<1x64x128xbf16> to vector<64x128xbf16>
    %cst_61 = arith.constant dense<0.000000e+00> : vector<1x128xf32>
    %159 = tpu.matmul %44, %158, %cst_61 {dimension_numbers = #tpu.dot_dimension_numbers<[1], [0], [0], [1], [0, 0, 1, 1], [], []>} : vector<1x64xbf16>, vector<64x128xbf16>, vector<1x128xf32> -> vector<1x128xf32>
    %160 = vector.extract_strided_slice %8 {offsets = [2, 1, 0], sizes = [1, 1, 128], strides = [1, 1, 1]} : vector<4x8x128xf32> to vector<1x1x128xf32>
    %161 = vector.shape_cast %160 : vector<1x1x128xf32> to vector<1x128xf32>
    %162 = arith.mulf %159, %161 : vector<1x128xf32>
    %163 = vector.extract_strided_slice %8 {offsets = [3, 1, 0], sizes = [1, 1, 128], strides = [1, 1, 1]} : vector<4x8x128xf32> to vector<1x1x128xf32>
    %164 = vector.shape_cast %163 : vector<1x1x128xf32> to vector<1x128xf32>
    %165 = arith.addf %162, %164 : vector<1x128xf32>
    %c1_62 = arith.constant 1 : index
    %c0_63 = arith.constant 0 : index
    %166 = vector.load %arg7[%c1_62, %c0_63] : memref<8x128xf32, #tpu.memory_space<vmem>>, vector<1x128xf32>
    tpu.vector_store %arg7[%c1_62, %c0_63], %165 {strides = array<i32>} : memref<8x128xf32, #tpu.memory_space<vmem>>, vector<1x128xf32>,
    %c2_64 = arith.constant 2 : index
    %c0_65 = arith.constant 0 : index
    %c0_66 = arith.constant 0 : index
    %167 = vector.load %arg8[%c2_64, %c0_65, %c0_66] : memref<4x64x128xbf16, #tpu.memory_space<vmem>>, vector<1x64x128xbf16>
    %168 = vector.shape_cast %167 : vector<1x64x128xbf16> to vector<64x128xbf16>
    %cst_67 = arith.constant dense<0.000000e+00> : vector<1x128xf32>
    %169 = tpu.matmul %62, %168, %cst_67 {dimension_numbers = #tpu.dot_dimension_numbers<[1], [0], [0], [1], [0, 0, 1, 1], [], []>} : vector<1x64xbf16>, vector<64x128xbf16>, vector<1x128xf32> -> vector<1x128xf32>
    %170 = vector.extract_strided_slice %8 {offsets = [2, 2, 0], sizes = [1, 1, 128], strides = [1, 1, 1]} : vector<4x8x128xf32> to vector<1x1x128xf32>
    %171 = vector.shape_cast %170 : vector<1x1x128xf32> to vector<1x128xf32>
    %172 = arith.mulf %169, %171 : vector<1x128xf32>
    %173 = vector.extract_strided_slice %8 {offsets = [3, 2, 0], sizes = [1, 1, 128], strides = [1, 1, 1]} : vector<4x8x128xf32> to vector<1x1x128xf32>
    %174 = vector.shape_cast %173 : vector<1x1x128xf32> to vector<1x128xf32>
    %175 = arith.addf %172, %174 : vector<1x128xf32>
    %c2_68 = arith.constant 2 : index
    %c0_69 = arith.constant 0 : index
    %176 = vector.load %arg7[%c2_68, %c0_69] : memref<8x128xf32, #tpu.memory_space<vmem>>, vector<1x128xf32>
    tpu.vector_store %arg7[%c2_68, %c0_69], %175 {strides = array<i32>} : memref<8x128xf32, #tpu.memory_space<vmem>>, vector<1x128xf32>,
    %c3_70 = arith.constant 3 : index
    %c0_71 = arith.constant 0 : index
    %c0_72 = arith.constant 0 : index
    %177 = vector.load %arg8[%c3_70, %c0_71, %c0_72] : memref<4x64x128xbf16, #tpu.memory_space<vmem>>, vector<1x64x128xbf16>
    %178 = vector.shape_cast %177 : vector<1x64x128xbf16> to vector<64x128xbf16>
    %cst_73 = arith.constant dense<0.000000e+00> : vector<1x128xf32>
    %179 = tpu.matmul %80, %178, %cst_73 {dimension_numbers = #tpu.dot_dimension_numbers<[1], [0], [0], [1], [0, 0, 1, 1], [], []>} : vector<1x64xbf16>, vector<64x128xbf16>, vector<1x128xf32> -> vector<1x128xf32>
    %180 = vector.extract_strided_slice %8 {offsets = [2, 3, 0], sizes = [1, 1, 128], strides = [1, 1, 1]} : vector<4x8x128xf32> to vector<1x1x128xf32>
    %181 = vector.shape_cast %180 : vector<1x1x128xf32> to vector<1x128xf32>
    %182 = arith.mulf %179, %181 : vector<1x128xf32>
    %183 = vector.extract_strided_slice %8 {offsets = [3, 3, 0], sizes = [1, 1, 128], strides = [1, 1, 1]} : vector<4x8x128xf32> to vector<1x1x128xf32>
    %184 = vector.shape_cast %183 : vector<1x1x128xf32> to vector<1x128xf32>
    %185 = arith.addf %182, %184 : vector<1x128xf32>
    %c3_74 = arith.constant 3 : index
    %c0_75 = arith.constant 0 : index
    %186 = vector.load %arg7[%c3_74, %c0_75] : memref<8x128xf32, #tpu.memory_space<vmem>>, vector<1x128xf32>
    tpu.vector_store %arg7[%c3_74, %c0_75], %185 {strides = array<i32>} : memref<8x128xf32, #tpu.memory_space<vmem>>, vector<1x128xf32>,
    %c1_i32_76 = arith.constant 1 : i32
    %187 = tpu.memref_slice %arg10[%c1_i32_76] : memref<2x!tpu.dma_semaphore, #tpu.memory_space<semaphore_mem>> -> memref<1x!tpu.dma_semaphore, #tpu.memory_space<semaphore_mem>>
    %188 = tpu.memref_squeeze %187 : memref<1x!tpu.dma_semaphore, #tpu.memory_space<semaphore_mem>> -> memref<!tpu.dma_semaphore, #tpu.memory_space<semaphore_mem>>
    tpu.wait_dma2 semaphore(%188 : memref<!tpu.dma_semaphore, #tpu.memory_space<semaphore_mem>>) src(%arg6 : memref<4x128x128xbf16, #tpu.memory_space<any>>) dst(%arg9 : memref<4x128x128xbf16, #tpu.memory_space<vmem>>)
    %c0_77 = arith.constant 0 : index
    %c0_78 = arith.constant 0 : index
    %c0_79 = arith.constant 0 : index
    %189 = vector.load %arg9[%c0_77, %c0_78, %c0_79] : memref<4x128x128xbf16, #tpu.memory_space<vmem>>, vector<1x128x128xbf16>
    %190 = vector.shape_cast %189 : vector<1x128x128xbf16> to vector<128x128xbf16>
    %cst_80 = arith.constant dense<0.000000e+00> : vector<1x128xf32>
    %191 = tpu.matmul %96, %190, %cst_80 {dimension_numbers = #tpu.dot_dimension_numbers<[1], [0], [0], [1], [0, 0, 1, 1], [], []>} : vector<1x128xbf16>, vector<128x128xbf16>, vector<1x128xf32> -> vector<1x128xf32>
    %192 = vector.extract_strided_slice %8 {offsets = [2, 4, 0], sizes = [1, 1, 128], strides = [1, 1, 1]} : vector<4x8x128xf32> to vector<1x1x128xf32>
    %193 = vector.shape_cast %192 : vector<1x1x128xf32> to vector<1x128xf32>
    %194 = arith.mulf %191, %193 : vector<1x128xf32>
    %195 = vector.extract_strided_slice %8 {offsets = [3, 4, 0], sizes = [1, 1, 128], strides = [1, 1, 1]} : vector<4x8x128xf32> to vector<1x1x128xf32>
    %196 = vector.shape_cast %195 : vector<1x1x128xf32> to vector<1x128xf32>
    %197 = arith.addf %194, %196 : vector<1x128xf32>
    %c4 = arith.constant 4 : index
    %c0_81 = arith.constant 0 : index
    %198 = vector.load %arg7[%c4, %c0_81] : memref<8x128xf32, #tpu.memory_space<vmem>>, vector<1x128xf32>
    tpu.vector_store %arg7[%c4, %c0_81], %197 {strides = array<i32>} : memref<8x128xf32, #tpu.memory_space<vmem>>, vector<1x128xf32>,
    %c1_82 = arith.constant 1 : index
    %c0_83 = arith.constant 0 : index
    %c0_84 = arith.constant 0 : index
    %199 = vector.load %arg9[%c1_82, %c0_83, %c0_84] : memref<4x128x128xbf16, #tpu.memory_space<vmem>>, vector<1x128x128xbf16>
    %200 = vector.shape_cast %199 : vector<1x128x128xbf16> to vector<128x128xbf16>
    %cst_85 = arith.constant dense<0.000000e+00> : vector<1x128xf32>
    %201 = tpu.matmul %112, %200, %cst_85 {dimension_numbers = #tpu.dot_dimension_numbers<[1], [0], [0], [1], [0, 0, 1, 1], [], []>} : vector<1x128xbf16>, vector<128x128xbf16>, vector<1x128xf32> -> vector<1x128xf32>
    %202 = vector.extract_strided_slice %8 {offsets = [2, 5, 0], sizes = [1, 1, 128], strides = [1, 1, 1]} : vector<4x8x128xf32> to vector<1x1x128xf32>
    %203 = vector.shape_cast %202 : vector<1x1x128xf32> to vector<1x128xf32>
    %204 = arith.mulf %201, %203 : vector<1x128xf32>
    %205 = vector.extract_strided_slice %8 {offsets = [3, 5, 0], sizes = [1, 1, 128], strides = [1, 1, 1]} : vector<4x8x128xf32> to vector<1x1x128xf32>
    %206 = vector.shape_cast %205 : vector<1x1x128xf32> to vector<1x128xf32>
    %207 = arith.addf %204, %206 : vector<1x128xf32>
    %c5 = arith.constant 5 : index
    %c0_86 = arith.constant 0 : index
    %208 = vector.load %arg7[%c5, %c0_86] : memref<8x128xf32, #tpu.memory_space<vmem>>, vector<1x128xf32>
    tpu.vector_store %arg7[%c5, %c0_86], %207 {strides = array<i32>} : memref<8x128xf32, #tpu.memory_space<vmem>>, vector<1x128xf32>,
    %c2_87 = arith.constant 2 : index
    %c0_88 = arith.constant 0 : index
    %c0_89 = arith.constant 0 : index
    %209 = vector.load %arg9[%c2_87, %c0_88, %c0_89] : memref<4x128x128xbf16, #tpu.memory_space<vmem>>, vector<1x128x128xbf16>
    %210 = vector.shape_cast %209 : vector<1x128x128xbf16> to vector<128x128xbf16>
    %cst_90 = arith.constant dense<0.000000e+00> : vector<1x128xf32>
    %211 = tpu.matmul %128, %210, %cst_90 {dimension_numbers = #tpu.dot_dimension_numbers<[1], [0], [0], [1], [0, 0, 1, 1], [], []>} : vector<1x128xbf16>, vector<128x128xbf16>, vector<1x128xf32> -> vector<1x128xf32>
    %212 = vector.extract_strided_slice %8 {offsets = [2, 6, 0], sizes = [1, 1, 128], strides = [1, 1, 1]} : vector<4x8x128xf32> to vector<1x1x128xf32>
    %213 = vector.shape_cast %212 : vector<1x1x128xf32> to vector<1x128xf32>
    %214 = arith.mulf %211, %213 : vector<1x128xf32>
    %215 = vector.extract_strided_slice %8 {offsets = [3, 6, 0], sizes = [1, 1, 128], strides = [1, 1, 1]} : vector<4x8x128xf32> to vector<1x1x128xf32>
    %216 = vector.shape_cast %215 : vector<1x1x128xf32> to vector<1x128xf32>
    %217 = arith.addf %214, %216 : vector<1x128xf32>
    %c6 = arith.constant 6 : index
    %c0_91 = arith.constant 0 : index
    %218 = vector.load %arg7[%c6, %c0_91] : memref<8x128xf32, #tpu.memory_space<vmem>>, vector<1x128xf32>
    tpu.vector_store %arg7[%c6, %c0_91], %217 {strides = array<i32>} : memref<8x128xf32, #tpu.memory_space<vmem>>, vector<1x128xf32>,
    %c3_92 = arith.constant 3 : index
    %c0_93 = arith.constant 0 : index
    %c0_94 = arith.constant 0 : index
    %219 = vector.load %arg9[%c3_92, %c0_93, %c0_94] : memref<4x128x128xbf16, #tpu.memory_space<vmem>>, vector<1x128x128xbf16>
    %220 = vector.shape_cast %219 : vector<1x128x128xbf16> to vector<128x128xbf16>
    %cst_95 = arith.constant dense<0.000000e+00> : vector<1x128xf32>
    %221 = tpu.matmul %144, %220, %cst_95 {dimension_numbers = #tpu.dot_dimension_numbers<[1], [0], [0], [1], [0, 0, 1, 1], [], []>} : vector<1x128xbf16>, vector<128x128xbf16>, vector<1x128xf32> -> vector<1x128xf32>
    %222 = vector.extract_strided_slice %8 {offsets = [2, 7, 0], sizes = [1, 1, 128], strides = [1, 1, 1]} : vector<4x8x128xf32> to vector<1x1x128xf32>
    %223 = vector.shape_cast %222 : vector<1x1x128xf32> to vector<1x128xf32>
    %224 = arith.mulf %221, %223 : vector<1x128xf32>
    %225 = vector.extract_strided_slice %8 {offsets = [3, 7, 0], sizes = [1, 1, 128], strides = [1, 1, 1]} : vector<4x8x128xf32> to vector<1x1x128xf32>
    %226 = vector.shape_cast %225 : vector<1x1x128xf32> to vector<1x128xf32>
    %227 = arith.addf %224, %226 : vector<1x128xf32>
    %c7 = arith.constant 7 : index
    %c0_96 = arith.constant 0 : index
    %228 = vector.load %arg7[%c7, %c0_96] : memref<8x128xf32, #tpu.memory_space<vmem>>, vector<1x128xf32>
    tpu.vector_store %arg7[%c7, %c0_96], %227 {strides = array<i32>} : memref<8x128xf32, #tpu.memory_space<vmem>>, vector<1x128xf32>,
    return
  }
}

</mosaic_0001>

<bundles_post_ra>
// kernel: forward.1
= control target key start
LH: loop header
LB: loop body
LE: loop exit
PB: predicated region body
PF: predicated region fallthrough
CT: control target
= control target key end

     0   :  { %12 = vsyncpa [#allocation6], 0  ;;  %s2851_s0 = inlined_call_operand.vmem [shape: f32[1,32], index: 0, kind: input, shape index: {}]   ;;  %s2852_s1 = inlined_call_operand.vmem [shape: bf16[32,1024], index: 1, kind: input, shape index: {}]   ;;  %s2853_s2 = inlined_call_operand.vmem [shape: f32[4,8,128], index: 2, kind: input, shape index: {}]   ;;  %s2854_s3 = inlined_call_operand.hbm [shape: bf16[4,64,128], index: 3, kind: input, shape index: {}]   ;;  %s2855_s4 = inlined_call_operand.hbm [shape: bf16[4,128,128], index: 4, kind: input, shape index: {}]   ;;  %s2856_s5 = inlined_call_operand.hbm [shape: bf16[4,64,128], index: 5, kind: input, shape index: {}]   ;;  %s2857_s6 = inlined_call_operand.vmem [shape: bf16[4,128,128], index: 6, kind: input, shape index: {}]   ;;  %s2858_s7 = inlined_call_operand.vmem [shape: f32[8,128], index: 7, kind: output, shape index: {}]  }
   0x1   :  { %13 = vsyncpa [#allocation8], 0  ;;  %s2282_s24 = smov [#allocation5]   ;;  %s2208_s28 = scalar_lea.hbm %s2854_s3, 2048 }
   0x2   :  { %s25_s25 = sshll.u32 %s2282_s24, 4  ;;  %p2209_p0 = scmp.ne.s32.totalorder %s2854_s3, %s2208_s28  ;;  %s26_s25 = int_to_ptr.vmem [resolvable:$true] %s25_s25 }
   0x3   :  { %p2212_p1 = scmp.lt.u32.totalorder %s2208_s28, %s2854_s3 }
   0x5   :  { %p2214_p2 = pnand %p2212_p1, %p2209_p0 }
   0x7   :  { %2217 = shalt.err (!%p2214_p2)
}
   0x8   :  { %s2218_s10 = scalar_lea.vmem %s26_s25, 2048  ;;  %p2223_p4 = scmp.lt.s32.totalorder %s26_s25, %s26_s25 }
   0x9   :  { %p2219_p3 = scmp.ne.s32.totalorder %s26_s25, %s2218_s10  ;;  %p2224_p5 = scmp.lt.s32.totalorder %s2218_s10, %s2218_s10 }
   0xb   :  { %p2225_p6 = por %p2224_p5, %p2223_p4 }
   0xd   :  { %p2226_p7 = pnand %p2225_p6, %p2219_p3 }
   0xf   :  { %2229 = shalt.err (!%p2226_p7)
}
  0x10   :  { %s2283_s11 = smov 64   ;;  %s2284_s12 = smov 4  }
  0x11   :  { %31 = dma.hbm_to_vmem [thread:$0]  %s2854_s3, 2048, %s26_s25, [#allocation6], %s2283_s11, %s2283_s11, %s2284_s12  }
  0x12   :  { %s2285_s15 = smov [#allocation7]   ;;  %s2230_s19 = scalar_lea.hbm %s2855_s4, 4096 }
  0x13   :  { %s37_s16 = sshll.u32 %s2285_s15, 4  ;;  %p2231_p8 = scmp.ne.s32.totalorder %s2855_s4, %s2230_s19  ;;  %s38_s16 = int_to_ptr.vmem [resolvable:$true] %s37_s16 }
  0x14   :  { %p2234_p9 = scmp.lt.u32.totalorder %s2230_s19, %s2855_s4 }
  0x16   :  { %p2236_p10 = pnand %p2234_p9, %p2231_p8 }
  0x18   :  { %2239 = shalt.err (!%p2236_p10)
}
  0x19   :  { %s2240_s24 = scalar_lea.vmem %s38_s16, 4096  ;;  %p2245_p12 = scmp.lt.s32.totalorder %s38_s16, %s38_s16 }
  0x1a   :  { %p2241_p11 = scmp.ne.s32.totalorder %s38_s16, %s2240_s24  ;;  %p2246_p13 = scmp.lt.s32.totalorder %s2240_s24, %s2240_s24 }
  0x1c   :  { %p2247_p0 = por %p2246_p13, %p2245_p12 }
  0x1e   :  { %p2248_p1 = pnand %p2247_p0, %p2241_p11 }
  0x20   :  { %2251 = shalt.err (!%p2248_p1)
}
  0x21   :  { %43 = dma.hbm_to_vmem [thread:$0]  %s2855_s4, 4096, %s38_s16, [#allocation8], %s2283_s11, %s2283_s11, %s2284_s12  }
  0x22   :  { %2274 = dma.done.wait [#allocation6], 2048  }
  0x23   :  { %2275 = vsyncadd [#allocation6], 4294965248 }
  0x24   :  { %2276 = dma.done.wait [#allocation8], 4096  }
  0x25   :  { %2277 = vsyncadd [#allocation8], 4294963200  ;;  %s2286_s26 = smov [#allocation2]   ;;  %s2252_s30 = scalar_lea.hbm %s2856_s5, 2048 }
  0x26   :  { %s58_s27 = sshll.u32 %s2286_s26, 4  ;;  %p2253_p2 = scmp.ne.s32.totalorder %s2856_s5, %s2252_s30  ;;  %s59_s27 = int_to_ptr.vmem [resolvable:$true] %s58_s27 }
  0x27   :  { %p2256_p3 = scmp.lt.u32.totalorder %s2252_s30, %s2856_s5 }
  0x29   :  { %p2258_p4 = pnand %p2256_p3, %p2253_p2 }
  0x2b   :  { %2261 = shalt.err (!%p2258_p4)  }
  0x2c   :  { %s2262_s4 = scalar_lea.vmem %s59_s27, 2048  ;;  %p2267_p6 = scmp.lt.s32.totalorder %s59_s27, %s59_s27 }
  0x2d   :  { %p2263_p5 = scmp.ne.s32.totalorder %s59_s27, %s2262_s4  ;;  %p2268_p7 = scmp.lt.s32.totalorder %s2262_s4, %s2262_s4 }
  0x2f   :  { %p2269_p8 = por %p2268_p7, %p2267_p6 }
  0x31   :  { %p2270_p9 = pnand %p2269_p8, %p2263_p5 }
  0x33   :  { %2273 = shalt.err (!%p2270_p9)  }
  0x34   :  { %61 = dma.hbm_to_vmem [thread:$0]  %s2856_s5, 2048, %s59_s27, [#allocation4]  ;;  %v2369_v0 = vld [vmem:[%s2857_s6] sm:$0xff]  ;;  %v2374_v1 = vld [vmem:[%s2857_s6 + $0x8] sm:$0xff]  ;;  %v2379_v2 = vld [vmem:[%s2857_s6 + $0x10] sm:$0xff] }
  0x35   :  { %v2384_v3 = vld [vmem:[%s2857_s6 + $0x18] sm:$0xff]  ;;  %v2389_v4 = vld [vmem:[%s2857_s6 + $0x20] sm:$0xff]  ;;  %v2394_v5 = vld [vmem:[%s2857_s6 + $0x28] sm:$0xff] }
  0x36   :  { %v2399_v6 = vld [vmem:[%s2857_s6 + $0x30] sm:$0xff]  ;;  %v2404_v7 = vld [vmem:[%s2857_s6 + $0x38] sm:$0xff]  ;;  %v2409_v8 = vld [vmem:[%s2857_s6 + $0x40] sm:$0xff] }
  0x37   :  { %v2414_v9 = vld [vmem:[%s2857_s6 + $0x48] sm:$0xff]  ;;  %v2419_v10 = vld [vmem:[%s2857_s6 + $0x50] sm:$0xff]  ;;  %v2424_v11 = vld [vmem:[%s2857_s6 + $0x58] sm:$0xff] }
  0x38   :  { %v2429_v12 = vld [vmem:[%s2857_s6 + $0x60] sm:$0xff]  ;;  %v2434_v13 = vld [vmem:[%s2857_s6 + $0x68] sm:$0xff]  ;;  %v2439_v14 = vld [vmem:[%s2857_s6 + $0x70] sm:$0xff] }
  0x39   :  { %v2444_v15 = vld [vmem:[%s2857_s6 + $0x78] sm:$0xff]  ;;  %v2449_v16 = vld [vmem:[%s2857_s6 + $0x80] sm:$0xff]  ;;  %v2454_v17 = vld [vmem:[%s2857_s6 + $0x88] sm:$0xff] }
  0x3a   :  { %v2459_v18 = vld [vmem:[%s2857_s6 + $0x90] sm:$0xff]  ;;  %v2464_v19 = vld [vmem:[%s2857_s6 + $0x98] sm:$0xff]  ;;  %v2469_v20 = vld [vmem:[%s2857_s6 + $0xa0] sm:$0xff] }
  0x3b   :  { %v2474_v21 = vld [vmem:[%s2857_s6 + $0xa8] sm:$0xff]  ;;  %v2479_v22 = vld [vmem:[%s2857_s6 + $0xb0] sm:$0xff]  ;;  %v2484_v23 = vld [vmem:[%s2857_s6 + $0xb8] sm:$0xff] }
  0x3c   :  { %v2489_v24 = vld [vmem:[%s2857_s6 + $0xc0] sm:$0xff]  ;;  %v2494_v25 = vld [vmem:[%s2857_s6 + $0xc8] sm:$0xff]  ;;  %v2499_v26 = vld [vmem:[%s2857_s6 + $0xd0] sm:$0xff] }
  0x3d   :  { %v2504_v27 = vld [vmem:[%s2857_s6 + $0xd8] sm:$0xff]  ;;  %v2509_v28 = vld [vmem:[%s2857_s6 + $0xe0] sm:$0xff]  ;;  %v2514_v29 = vld [vmem:[%s2857_s6 + $0xe8] sm:$0xff] }
  0x3e   :  { %v2519_v30 = vld [vmem:[%s2857_s6 + $0xf0] sm:$0xff]  ;;  %v2524_v31 = vld [vmem:[%s2857_s6 + $0xf8] sm:$0xff] }
  0x3f   :  { %166 = vsyncadd [#allocation4 + $0x1], 4096  ;;  %v169_v32 = vld [vmem:[%s2852_s1] sm:$0xff]  ;;  %v2287_v38 = vmov 0   ;;  %v170_v40 = vld [vmem:[%s2852_s1 + $0x8] sm:$0xff]  ;;  %vm265_vm0 = vcmask 261120  }
  0x40   :  { %v173_v33 = vld [vmem:[%s2852_s1 + $0x20] sm:$0xff]  ;;  %301 = vmatprep.mubr.bf16.mxu0 %v2287_v38  ;;  %342 = vmatprep.mubr.bf16.mxu1 %v2287_v38  ;;  %v174_v41 = vld [vmem:[%s2852_s1 + $0x28] sm:$0xff]  ;;  %v171_v46 = vld [vmem:[%s2852_s1 + $0x10] sm:$0xff]  ;;  %vm2289_vm1 = vmmov 0   ;;  %vm472_vm2 = vcmask 523264  }
  0x41   :  { %v1707_v34 = vcombine.high %v169_v32, %v173_v33  ;;  %v1706_v35 = vcombine.low %v169_v32, %v173_v33  ;;  %v177_v36 = vld [vmem:[%s2852_s1 + $0x40] sm:$0xff]  ;;  %v178_v42 = vld [vmem:[%s2852_s1 + $0x48] sm:$0xff]  ;;  %v1709_v43 = vcombine.high %v170_v40, %v174_v41  ;;  %v1708_v44 = vcombine.low %v170_v40, %v174_v41  ;;  %v175_v47 = vld [vmem:[%s2852_s1 + $0x30] sm:$0xff] }
  0x42   :  { %v181_v37 = vld [vmem:[%s2852_s1 + $0x60] sm:$0xff]  ;;  %v182_v45 = vld [vmem:[%s2852_s1 + $0x68] sm:$0xff]  ;;  %v172_v51 = vld [vmem:[%s2852_s1 + $0x18] sm:$0xff]  ;;  %v1711_v52 = vcombine.high %v171_v46, %v175_v47  ;;  %v1710_v62 = vcombine.low %v171_v46, %v175_v47  ;;  %v2288_v40 = vmov 0.0  }
  0x43   :  { %v1715_v39 = vcombine.high %v177_v36, %v181_v37  ;;  %269 = vmatprep.subr.bf16.mxu0 %v1707_v34  ;;  %v1714_v48 = vcombine.low %v177_v36, %v181_v37  ;;  %v167_v49 = vld [vmem:[%s2851_s0] sm:$0x1]  ;;  %v1717_v50 = vcombine.high %v178_v42, %v182_v45  ;;  %310 = vmatprep.subr.bf16.mxu1 %v1709_v43  ;;  %v179_v53 = vld [vmem:[%s2852_s1 + $0x50] sm:$0xff]  ;;  %v176_v55 = vld [vmem:[%s2852_s1 + $0x38] sm:$0xff] }
  0x44   :  { %270 = vmatpush1.bf16.msra.mxu0 %v1706_v35  ;;  %v183_v54 = vld [vmem:[%s2852_s1 + $0x70] sm:$0xff]  ;;  %311 = vmatpush1.bf16.msra.mxu1 %v1708_v44  ;;  %v1716_v56 = vcombine.low %v178_v42, %v182_v45  ;;  %v2579_v58 = vld [vmem:[%s2853_s2 + $0x18] sm:$0xff]  ;;  %v168_v59 = vpack.c.bf16 %v167_v49, %v167_v49  ;;  %v1713_v60 = vcombine.high %v172_v51, %v176_v55  ;;  %v2160_v37 = vld [vmem:[#allocation5] sm:$0xff]  }
  0x45   :  { %271 = vmatprep.subr.bf16.mxu0 %v1715_v39  ;;  %v2574_v57 = vld [vmem:[%s2853_s2 + $0x10] sm:$0xff]  ;;  %312 = vmatprep.subr.bf16.mxu1 %v1717_v50  ;;  %v180_v61 = vld [vmem:[%s2852_s1 + $0x58] sm:$0xff]  ;;  %v1719_v32 = vcombine.high %v179_v53, %v183_v54  ;;  %v1712_v33 = vcombine.low %v172_v51, %v176_v55  ;;  %v1718_v35 = vcombine.low %v179_v53, %v183_v54  ;;  %v2161_v39 = vld [vmem:[#allocation5 + $0x20] sm:$0xff]  }
  0x46   :  { %v184_v63 = vld [vmem:[%s2852_s1 + $0x78] sm:$0xff]  ;;  %v2162_v41 = vld [vmem:[#allocation5 + $0x8] sm:$0xff]   ;;  %v2165_v43 = vld [vmem:[#allocation5 + $0x30] sm:$0xff]  }
  0x47   :  { %v1721_v34 = vcombine.high %v180_v61, %v184_v63  ;;  %v1720_v36 = vcombine.low %v180_v61, %v184_v63  ;;  %v2163_v42 = vld [vmem:[#allocation5 + $0x28] sm:$0xff]   ;;  %v2166_v44 = vld [vmem:[#allocation5 + $0x18] sm:$0xff]   ;;  %v2608_v46 = vld [vmem:[%s2853_s2] sm:$0xff] }
  0x48   :  { %272 = vmatpush1.bf16.msra.mxu0 %v1714_v48  ;;  %313 = vmatpush1.bf16.msra.mxu1 %v1716_v56  ;;  %v2167_v45 = vld [vmem:[#allocation5 + $0x38] sm:$0xff]   ;;  %v519_v47 = vrot.slane %v2608_v46, 1  ;;  %v2169_v63 = vld [vmem:[#allocation5 + $0x60] sm:$0xff]  }
  0x49   :  { %351 = vmatprep.subr.bf16.mxu0 %v1711_v52  ;;  %392 = vmatprep.subr.bf16.mxu1 %v1713_v60  ;;  %v2168_v60 = vld [vmem:[#allocation5 + $0x40] sm:$0xff]  }
  0x4b   :  { %1722 = vmatmul.mubr.msk.bf16.vlgmr.msra.gmra.mrb[0].mxu0 %vm265_vm0, %v168_v59  ;;  %1723 = vmatmul.mubr.msk.bf16.vlgmr.msra.gmra.mrb[0].mxu1 %vm265_vm0, %v168_v59 }
  0x4c   :  { %352 = vmatpush1.bf16.msra.mxu0 %v1710_v62  ;;  %383 = vmatprep.mubr.bf16.mxu0 %v2287_v38 }
  0x4d   :  { %353 = vmatprep.subr.bf16.mxu0 %v1719_v32  ;;  %393 = vmatpush1.bf16.msra.mxu1 %v1712_v33 }
  0x4e   :  { %424 = vmatprep.mubr.bf16.mxu1 %v2287_v38  ;;  %394 = vmatprep.subr.bf16.mxu1 %v1721_v34  ;;  %v2164_v38 = vld [vmem:[#allocation5 + $0x10] sm:$0xff]   ;;  %v605_v34 = vrot.slane %v2608_v46, 2 }
  0x50   :  { %354 = vmatpush1.bf16.msra.mxu0 %v1718_v35  ;;  %v2170_v35 = vld [vmem:[#allocation5 + $0x48] sm:$0xff]  }
  0x51   :  { %1896 = vmatprep.subr.bf16.mxu0 %v2288_v40  ;;  %395 = vmatpush1.bf16.msra.mxu1 %v1720_v36  ;;  %v690_v36 = vrot.slane %v2608_v46, 3 }
  0x52   :  { %1908 = vmatprep.subr.bf16.mxu1 %v2288_v40 }
  0x53   :  { %1724 = vmatmul.mubr.msk.bf16.vlgmr.msra.gmra.mrb[4].mxu0 %vm265_vm0, %v168_v59 }
  0x54   :  { %1897 = vmatpush3.bf16.msra.mxu0 %v2160_v37  ;;  %1725 = vmatmul.mubr.msk.bf16.vlgmr.msra.gmra.mrb[4].mxu1 %vm265_vm0, %v168_v59 }
  0x55   :  { %1898 = vmatprep.subr.bf16.mxu0 %v2288_v40  ;;  %1909 = vmatpush3.bf16.msra.mxu1 %v2161_v39  ;;  %v2171_v39 = vld [vmem:[#allocation5 + $0x68] sm:$0xff]  }
  0x56   :  { %1910 = vmatprep.subr.bf16.mxu1 %v2288_v40  ;;  %1904 = vmatprep.mubr.msk.bf16.mxu0 %vm2289_vm1, %v2288_v40 }
  0x57   :  { %1916 = vmatprep.mubr.msk.bf16.mxu1 %vm2289_vm1, %v2288_v40 }
  0x58   :  { %1899 = vmatpush3.bf16.msra.mxu0 %v2162_v41 }
  0x59   :  { %1900 = vmatprep.subr.bf16.mxu0 %v2288_v40  ;;  %1911 = vmatpush3.bf16.msra.mxu1 %v2163_v42 }
  0x5a   :  { %1912 = vmatprep.subr.bf16.mxu1 %v2288_v40 }
  0x5c   :  { %1901 = vmatpush3.bf16.msra.mxu0 %v2164_v38 }
  0x5d   :  { %1902 = vmatprep.subr.bf16.mxu0 %v2288_v40  ;;  %1913 = vmatpush3.bf16.msra.mxu1 %v2165_v43 }
  0x5e   :  { %1914 = vmatprep.subr.bf16.mxu1 %v2288_v40 }
  0x60   :  { %1903 = vmatpush3.bf16.msra.mxu0 %v2166_v44 }
  0x61   :  { %1915 = vmatpush3.bf16.msra.mxu1 %v2167_v45  ;;  %1920 = vmatprep.subr.bf16.mxu0 %v2288_v40 }
  0x62   :  { %1932 = vmatprep.subr.bf16.mxu1 %v2288_v40 }
 0x11e   :  { %v303_v48 = vpop.f32.mrb[0].mxu0  ;;  %v344_v53 = vpop.f32.mrb[0].mxu1 }
 0x11f   :  { %v437_v49 = vadd.f32 %v2608_v46, %v303_v48  ;;  %v305_v50 = vpop.f32.mrb[1].mxu0  ;;  %v346_v56 = vpop.f32.mrb[1].mxu1  ;;  %v607_v43 = vadd.f32 %v605_v34, %v344_v53  ;;  %v2172_v48 = vld [vmem:[#allocation5 + $0x50] sm:$0xff]   ;;  %v2174_v53 = vld [vmem:[#allocation5 + $0x58] sm:$0xff]  }
 0x120   :  { %v521_v51 = vadd.f32 %v519_v47, %v305_v50  ;;  %v307_v52 = vpop.f32.mrb[2].mxu0  ;;  %v348_v61 = vpop.f32.mrb[2].mxu1  ;;  %v692_v47 = vadd.f32 %v690_v36, %v346_v56  ;;  %v2173_v50 = vld [vmem:[#allocation5 + $0x70] sm:$0xff]   ;;  %v2182_v34 = vld [vmem:[#allocation7 + $0x18] sm:$0xff]   ;;  %v2184_v36 = vld [vmem:[#allocation7 + $0x20] sm:$0xff]  }
 0x121   :  { %v438_v54 = vmax.f32 %v437_v49, 0.0  ;;  %v308_v55 = vpop.f32.mrb[3].mxu0  ;;  %v349_v32 = vpop.f32.mrb[3].mxu1  ;;  %v608_v52 = vmax.f32 %v607_v43, 0.0  ;;  %v2177_v61 = vld [vmem:[#allocation7 + $0x40] sm:$0xff]   ;;  %v2186_v43 = vld [vmem:[#allocation7 + $0x28] sm:$0xff]  }
 0x122   :  { %v522_v59 = vmax.f32 %v521_v51, 0.0  ;;  %v2175_v55 = vld [vmem:[#allocation5 + $0x78] sm:$0xff]   ;;  %v2180_v32 = vld [vmem:[#allocation7 + $0x10] sm:$0xff]  }
 0x123   :  { %v439_v62 = vpack.c.bf16 %v438_v54, %v438_v54  ;;  %v693_v54 = vmax.f32 %v692_v47, 0.0  ;;  %v609_v56 = vpack.c.bf16 %v608_v52, %v608_v52  ;;  %v2187_v47 = vld [vmem:[#allocation7 + $0x68] sm:$0xff]  }
 0x124   :  { %v523_v33 = vpack.c.bf16 %v522_v59, %v522_v59 }
 0x125   :  { %1905 = vmatmul.mubr.msk.bf16.vlgmr.msra.gmra.mrb[8].mxu0 %vm472_vm2, %v439_v62  ;;  %v694_v59 = vpack.c.bf16 %v693_v54, %v693_v54  ;;  %v2178_v62 = vld [vmem:[#allocation7 + $0x8] sm:$0xff]  }
 0x126   :  { %1921 = vmatpush3.bf16.msra.mxu0 %v2168_v60  ;;  %1917 = vmatmul.mubr.msk.bf16.vlgmr.msra.gmra.mrb[8].mxu1 %vm472_vm2, %v523_v33  ;;  %v2616_v37 = vpop.f32.mrb[4].mxu0  ;;  %v2176_v60 = vld [vmem:[#allocation7] sm:$0xff]   ;;  %v2181_v33 = vld [vmem:[#allocation7 + $0x50] sm:$0xff]  }
 0x127   :  { %1933 = vmatpush3.bf16.msra.mxu1 %v2169_v63  ;;  %1922 = vmatprep.subr.bf16.mxu0 %v2288_v40  ;;  %v2619_v41 = vpop.f32.mrb[5].mxu0  ;;  %v2624_v38 = vpop.f32.mrb[4].mxu1  ;;  %v2179_v63 = vld [vmem:[#allocation7 + $0x48] sm:$0xff]  }
 0x128   :  { %1934 = vmatprep.subr.bf16.mxu1 %v2288_v40  ;;  %1928 = vmatprep.mubr.msk.bf16.mxu0 %vm2289_vm1, %v2288_v40  ;;  %v389_v42 = vpop.f32.mrb[6].mxu0  ;;  %v2628_v45 = vpop.f32.mrb[5].mxu1 }
 0x129   :  { %1940 = vmatprep.mubr.msk.bf16.mxu1 %vm2289_vm1, %v2288_v40  ;;  %v390_v44 = vpop.f32.mrb[7].mxu0  ;;  %v430_v49 = vpop.f32.mrb[6].mxu1  ;;  %v775_v42 = vrot.slane %v2608_v46, 4 }
 0x12a   :  { %1923 = vmatpush3.bf16.msra.mxu0 %v2170_v35  ;;  %v431_v51 = vpop.f32.mrb[7].mxu1  ;;  %v2183_v35 = vld [vmem:[#allocation7 + $0x58] sm:$0xff]   ;;  %v888_v44 = vrot.slane %v2608_v46, 5 }
 0x12b   :  { %1935 = vmatpush3.bf16.msra.mxu1 %v2171_v39  ;;  %1924 = vmatprep.subr.bf16.mxu0 %v2288_v40  ;;  %v2185_v39 = vld [vmem:[#allocation7 + $0x60] sm:$0xff]   ;;  %v2189_v51 = vld [vmem:[#allocation7 + $0x70] sm:$0xff]  }
 0x12c   :  { %1936 = vmatprep.subr.bf16.mxu1 %v2288_v40  ;;  %v890_v49 = vadd.f32 %v888_v44, %v2619_v41  ;;  %v2192_v41 = vld [vmem:[#allocation7 + $0x80] sm:$0xff]  }
 0x12e   :  { %1925 = vmatpush3.bf16.msra.mxu0 %v2172_v48  ;;  %v777_v48 = vadd.f32 %v775_v42, %v2616_v37  ;;  %v891_v54 = vmax.f32 %v890_v49, 0.0  ;;  %v1116_v42 = vrot.slane %v2608_v46, 7  ;;  %v2205_v49 = vld [vmem:[#allocation7 + $0xf0] sm:$0xff]  }
 0x12f   :  { %1937 = vmatpush3.bf16.msra.mxu1 %v2173_v50  ;;  %1926 = vmatprep.subr.bf16.mxu0 %v2288_v40  ;;  %v2188_v50 = vld [vmem:[#allocation7 + $0x30] sm:$0xff]  }
 0x130   :  { %1938 = vmatprep.subr.bf16.mxu1 %v2288_v40  ;;  %v778_v52 = vmax.f32 %v777_v48, 0.0  ;;  %v2204_v48 = vld [vmem:[#allocation7 + $0xb0] sm:$0xff]  }
 0x132   :  { %1927 = vmatpush3.bf16.msra.mxu0 %v2174_v53  ;;  %v2190_v53 = vld [vmem:[#allocation7 + $0x38] sm:$0xff]   ;;  %v779_v37 = vpack.c.bf16 %v778_v52, %v778_v52 }
 0x133   :  { %1939 = vmatpush3.bf16.msra.mxu1 %v2175_v55  ;;  %1944 = vmatprep.subr.bf16.mxu0 %v2288_v40  ;;  %v2191_v55 = vld [vmem:[#allocation7 + $0x78] sm:$0xff]  }
 0x134   :  { %1964 = vmatprep.subr.bf16.mxu1 %v2288_v40  ;;  %v2207_v52 = vld [vmem:[#allocation7 + $0xf8] sm:$0xff]  }
 0x135   :  { %1929 = vmatmul.mubr.msk.bf16.vlgmr.msra.gmra.mrb[12].mxu0 %vm472_vm2, %v609_v56  ;;  %v892_v56 = vpack.c.bf16 %v891_v54, %v891_v54 }
 0x136   :  { %1941 = vmatmul.mubr.msk.bf16.vlgmr.msra.gmra.mrb[12].mxu1 %vm472_vm2, %v694_v59  ;;  %1945 = vmatpush3.bf16.msra.mxu0 %v2176_v60  ;;  %v2193_v59 = vld [vmem:[#allocation7 + $0xc0] sm:$0xff]   ;;  %v2194_v60 = vld [vmem:[#allocation7 + $0x88] sm:$0xff]  }
 0x137   :  { %1965 = vmatpush3.bf16.msra.mxu1 %v2177_v61  ;;  %1946 = vmatprep.subr.bf16.mxu0 %v2288_v40  ;;  %v2195_v61 = vld [vmem:[#allocation7 + $0xc8] sm:$0xff]  }
 0x138   :  { %1966 = vmatprep.subr.bf16.mxu1 %v2288_v40  ;;  %1960 = vmatprep.mubr.msk.bf16.mxu0 %vm2289_vm1, %v2288_v40 }
 0x139   :  { %1980 = vmatprep.mubr.msk.bf16.mxu1 %vm2289_vm1, %v2288_v40 }
 0x13a   :  { %1947 = vmatpush3.bf16.msra.mxu0 %v2178_v62  ;;  %v2196_v62 = vld [vmem:[#allocation7 + $0x90] sm:$0xff]  }
 0x13b   :  { %1967 = vmatpush3.bf16.msra.mxu1 %v2179_v63  ;;  %1948 = vmatprep.subr.bf16.mxu0 %v2288_v40  ;;  %v2197_v63 = vld [vmem:[#allocation7 + $0xd0] sm:$0xff]  }
 0x13c   :  { %1968 = vmatprep.subr.bf16.mxu1 %v2288_v40 }
 0x13e   :  { %1949 = vmatpush3.bf16.msra.mxu0 %v2180_v32  ;;  %v2198_v32 = vld [vmem:[#allocation7 + $0x98] sm:$0xff]  }
 0x13f   :  { %1969 = vmatpush3.bf16.msra.mxu1 %v2181_v33  ;;  %1950 = vmatprep.subr.bf16.mxu0 %v2288_v40  ;;  %v2199_v33 = vld [vmem:[#allocation7 + $0xd8] sm:$0xff]  }
 0x140   :  { %1970 = vmatprep.subr.bf16.mxu1 %v2288_v40 }
 0x142   :  { %1951 = vmatpush3.bf16.msra.mxu0 %v2182_v34  ;;  %v2200_v34 = vld [vmem:[#allocation7 + $0xa0] sm:$0xff]  }
 0x143   :  { %1971 = vmatpush3.bf16.msra.mxu1 %v2183_v35  ;;  %1952 = vmatprep.subr.bf16.mxu0 %v2288_v40  ;;  %v2201_v35 = vld [vmem:[#allocation7 + $0xe0] sm:$0xff]  }
 0x144   :  { %1972 = vmatprep.subr.bf16.mxu1 %v2288_v40 }
 0x146   :  { %1953 = vmatpush3.bf16.msra.mxu0 %v2184_v36  ;;  %v1002_v36 = vrot.slane %v2608_v46, 6 }
 0x147   :  { %1973 = vmatpush3.bf16.msra.mxu1 %v2185_v39  ;;  %1954 = vmatprep.subr.bf16.mxu0 %v2288_v40  ;;  %v2202_v39 = vld [vmem:[#allocation7 + $0xa8] sm:$0xff]  }
 0x148   :  { %1974 = vmatprep.subr.bf16.mxu1 %v2288_v40  ;;  %v1004_v44 = vadd.f32 %v1002_v36, %v2624_v38 }
 0x14a   :  { %1955 = vmatpush3.bf16.msra.mxu0 %v2186_v43  ;;  %v2203_v43 = vld [vmem:[#allocation7 + $0xe8] sm:$0xff]  }
 0x14b   :  { %1975 = vmatpush3.bf16.msra.mxu1 %v2187_v47  ;;  %1956 = vmatprep.subr.bf16.mxu0 %v2288_v40  ;;  %v1118_v47 = vadd.f32 %v1116_v42, %v2628_v45  ;;  %v434_v45 = vld [vmem:[%s2853_s2 + $0x8] sm:$0xff] }
 0x14c   :  { %1976 = vmatprep.subr.bf16.mxu1 %v2288_v40  ;;  %v728_v42 = vrot.slane %v434_v45, 3 }
 0x14d   :  { %v1119_v46 = vmax.f32 %v1118_v47, 0.0 }
 0x14e   :  { %1957 = vmatpush3.bf16.msra.mxu0 %v2188_v50  ;;  %v1005_v50 = vmax.f32 %v1004_v44, 0.0 }
 0x14f   :  { %1977 = vmatpush3.bf16.msra.mxu1 %v2189_v51  ;;  %1958 = vmatprep.subr.bf16.mxu0 %v2288_v40  ;;  %v2206_v51 = vld [vmem:[#allocation7 + $0xb8] sm:$0xff]   ;;  %v1120_v54 = vpack.c.bf16 %v1119_v46, %v1119_v46 }
 0x150   :  { %1978 = vmatprep.subr.bf16.mxu1 %v2288_v40  ;;  %v1006_v38 = vpack.c.bf16 %v1005_v50, %v1005_v50 }
 0x152   :  { %1959 = vmatpush3.bf16.msra.mxu0 %v2190_v53  ;;  %v558_v53 = vrot.slane %v434_v45, 1 }
 0x153   :  { %1979 = vmatpush3.bf16.msra.mxu1 %v2191_v55  ;;  %1984 = vmatprep.subr.bf16.mxu0 %v2288_v40 }
 0x154   :  { %2004 = vmatprep.subr.bf16.mxu1 %v2288_v40 }
 0x155   :  { %1961 = vmatmul.mubr.bf16.vlgmr.msra.gmra.mrb[16].mxu0 %v779_v37 }
 0x156   :  { %1981 = vmatmul.mubr.bf16.vlgmr.msra.gmra.mrb[16].mxu1 %v892_v56  ;;  %1985 = vmatpush3.bf16.msra.mxu0 %v2192_v41 }
 0x157   :  { %2005 = vmatpush3.bf16.msra.mxu1 %v2193_v59  ;;  %1986 = vmatprep.subr.bf16.mxu0 %v2288_v40 }
 0x158   :  { %2006 = vmatprep.subr.bf16.mxu1 %v2288_v40  ;;  %2000 = vmatprep.mubr.msk.bf16.mxu0 %vm2289_vm1, %v2288_v40 }
 0x159   :  { %2020 = vmatprep.mubr.msk.bf16.mxu1 %vm2289_vm1, %v2288_v40 }
 0x15a   :  { %1987 = vmatpush3.bf16.msra.mxu0 %v2194_v60 }
 0x15b   :  { %2007 = vmatpush3.bf16.msra.mxu1 %v2195_v61  ;;  %1988 = vmatprep.subr.bf16.mxu0 %v2288_v40 }
 0x15c   :  { %2008 = vmatprep.subr.bf16.mxu1 %v2288_v40 }
 0x15e   :  { %1989 = vmatpush3.bf16.msra.mxu0 %v2196_v62 }
 0x15f   :  { %2009 = vmatpush3.bf16.msra.mxu1 %v2197_v63  ;;  %1990 = vmatprep.subr.bf16.mxu0 %v2288_v40 }
 0x160   :  { %2010 = vmatprep.subr.bf16.mxu1 %v2288_v40 }
 0x162   :  { %1991 = vmatpush3.bf16.msra.mxu0 %v2198_v32 }
 0x163   :  { %2011 = vmatpush3.bf16.msra.mxu1 %v2199_v33  ;;  %1992 = vmatprep.subr.bf16.mxu0 %v2288_v40 }
 0x164   :  { %2012 = vmatprep.subr.bf16.mxu1 %v2288_v40 }
 0x166   :  { %1993 = vmatpush3.bf16.msra.mxu0 %v2200_v34 }
 0x167   :  { %2013 = vmatpush3.bf16.msra.mxu1 %v2201_v35  ;;  %1994 = vmatprep.subr.bf16.mxu0 %v2288_v40 }
 0x168   :  { %2014 = vmatprep.subr.bf16.mxu1 %v2288_v40 }
 0x16a   :  { %1995 = vmatpush3.bf16.msra.mxu0 %v2202_v39  ;;  %v643_v39 = vrot.slane %v434_v45, 2 }
 0x16b   :  { %2015 = vmatpush3.bf16.msra.mxu1 %v2203_v43  ;;  %1996 = vmatprep.subr.bf16.mxu0 %v2288_v40 }
 0x16c   :  { %2016 = vmatprep.subr.bf16.mxu1 %v2288_v40 }
 0x16e   :  { %1997 = vmatpush3.bf16.msra.mxu0 %v2204_v48 }
 0x16f   :  { %2017 = vmatpush3.bf16.msra.mxu1 %v2205_v49  ;;  %1998 = vmatprep.subr.bf16.mxu0 %v2288_v40 }
 0x170   :  { %2018 = vmatprep.subr.bf16.mxu1 %v2288_v40 }
 0x172   :  { %1999 = vmatpush3.bf16.msra.mxu0 %v2206_v51 }
 0x173   :  { %2019 = vmatpush3.bf16.msra.mxu1 %v2207_v52 }
 0x175   :  { %2001 = vmatmul.mubr.bf16.vlgmr.msra.gmra.mrb[20].mxu0 %v1006_v38 }
 0x176   :  { %2021 = vmatmul.mubr.bf16.vlgmr.msra.gmra.mrb[20].mxu1 %v1120_v54 }
 0x1f8   :  { %v510_v55 = vpop.f32.mrb[8].mxu0 }
 0x1f9   :  { %v511_v37 = vadd.f32 %v510_v55, %v434_v45  ;;  %v1906_v56 = vpop.f32.mrb[9].mxu0  ;;  %v597_v41 = vpop.f32.mrb[8].mxu1 }
 0x1fa   :  { %v598_v59 = vadd.f32 %v597_v41, %v558_v53  ;;  %v513_v60 = vpop.f32.mrb[10].mxu0  ;;  %v1918_v61 = vpop.f32.mrb[9].mxu1  ;;  %v844_v56 = vrot.slane %v434_v45, 4  ;;  %v958_v41 = vrot.slane %v434_v45, 5 }
 0x1fb   :  { %v516_v62 = vmax.f32 %v511_v37, 0.0  ;;  %v1907_v63 = vpop.f32.mrb[11].mxu0  ;;  %v600_v32 = vpop.f32.mrb[10].mxu1 }
 0x1fc   :  { %v603_v33 = vmax.f32 %v598_v59, 0.0  ;;  %v1919_v34 = vpop.f32.mrb[11].mxu1 }
 0x1fd   :  { %v2687_v35 = vpack.c.bf16 %v516_v62, %v516_v62 }
 0x1fe   :  { %v2689_v36 = vpack.c.bf16 %v603_v33, %v603_v33 }
 0x208   :  { %v682_v43 = vpop.f32.mrb[12].mxu0 }
 0x209   :  { %v683_v44 = vadd.f32 %v682_v43, %v643_v39  ;;  %v1930_v47 = vpop.f32.mrb[13].mxu0  ;;  %v767_v48 = vpop.f32.mrb[12].mxu1 }
 0x20a   :  { %v768_v49 = vadd.f32 %v767_v48, %v728_v42  ;;  %v685_v50 = vpop.f32.mrb[14].mxu0  ;;  %v1942_v46 = vpop.f32.mrb[13].mxu1 }
 0x20b   :  { %v688_v51 = vmax.f32 %v683_v44, 0.0  ;;  %v1931_v52 = vpop.f32.mrb[15].mxu0  ;;  %v770_v38 = vpop.f32.mrb[14].mxu1  ;;  %v1186_v50 = vrot.slane %v434_v45, 7 }
 0x20c   :  { %v773_v54 = vmax.f32 %v768_v49, 0.0  ;;  %v1943_v53 = vpop.f32.mrb[15].mxu1  ;;  %v1072_v49 = vrot.slane %v434_v45, 6 }
 0x20d   :  { %v2691_v55 = vpack.c.bf16 %v688_v51, %v688_v51 }
 0x20e   :  { %v2693_v37 = vpack.c.bf16 %v773_v54, %v773_v54 }
 0x228   :  { %v880_v59 = vpop.f32.mrb[16].mxu0 }
 0x229   :  { %v881_v60 = vadd.f32 %v880_v59, %v844_v56  ;;  %v1962_v61 = vpop.f32.mrb[17].mxu0  ;;  %v994_v62 = vpop.f32.mrb[16].mxu1 }
 0x22a   :  { %v995_v63 = vadd.f32 %v994_v62, %v958_v41  ;;  %v883_v32 = vpop.f32.mrb[18].mxu0  ;;  %v1982_v33 = vpop.f32.mrb[17].mxu1 }
 0x22b   :  { %v886_v34 = vmax.f32 %v881_v60, 0.0  ;;  %v1963_v39 = vpop.f32.mrb[19].mxu0  ;;  %v997_v42 = vpop.f32.mrb[18].mxu1 }
 0x22c   :  { %v1000_v43 = vmax.f32 %v995_v63, 0.0  ;;  %v1983_v44 = vpop.f32.mrb[19].mxu1 }
 0x22d   :  { %v2695_v47 = vpack.c.bf16 %v886_v34, %v886_v34 }
 0x22e   :  { %v2697_v48 = vpack.c.bf16 %v1000_v43, %v1000_v43 }
 0x248   :  { %v1108_v46 = vpop.f32.mrb[20].mxu0 }
 0x249   :  { %v1109_v51 = vadd.f32 %v1108_v46, %v1072_v49  ;;  %v2002_v52 = vpop.f32.mrb[21].mxu0  ;;  %v1222_v38 = vpop.f32.mrb[20].mxu1 }
 0x24a   :  { %v1223_v54 = vadd.f32 %v1222_v38, %v1186_v50  ;;  %v1111_v53 = vpop.f32.mrb[22].mxu0  ;;  %v2022_v56 = vpop.f32.mrb[21].mxu1 }
 0x24b   :  { %v1114_v41 = vmax.f32 %v1109_v51, 0.0  ;;  %v2003_v59 = vpop.f32.mrb[23].mxu0  ;;  %v1225_v60 = vpop.f32.mrb[22].mxu1 }
 0x24c   :  { %v1228_v61 = vmax.f32 %v1223_v54, 0.0  ;;  %v2023_v62 = vpop.f32.mrb[23].mxu1 }
 0x24d   :  { %v2699_v63 = vpack.c.bf16 %v1114_v41, %v1114_v41 }
 0x24e   :  { %v2701_v32 = vpack.c.bf16 %v1228_v61, %v1228_v61 }
 0x24f   :  { %2278 = dma.done.wait [#allocation4], 2048 }
 0x250   :  { %2279 = vsyncadd [#allocation4], 4294965248  ;;  %2024 = vmatprep.subr.bf16.mxu0 %v2288_v40  ;;  %2036 = vmatprep.subr.bf16.mxu1 %v2288_v40  ;;  %v1235_v45 = vld [vmem:[#allocation2] sm:$0xff]  ;;  %v1236_v34 = vld [vmem:[#allocation2 + $0x8] sm:$0xff]  ;;  %v1334_v53 = vrot.slane %v2574_v57, 1  ;;  %v1338_v56 = vrot.slane %v2579_v58, 1 }
 0x251   :  { %2032 = vmatprep.mubr.msk.bf16.mxu0 %vm2289_vm1, %v2288_v40  ;;  %2044 = vmatprep.mubr.msk.bf16.mxu1 %vm2289_vm1, %v2288_v40  ;;  %v1286_v33 = vld [vmem:[#allocation2 + $0x20] sm:$0xff]  ;;  %v1287_v39 = vld [vmem:[#allocation2 + $0x28] sm:$0xff]  ;;  %v1237_v42 = vld [vmem:[#allocation2 + $0x10] sm:$0xff] }
 0x252   :  { %2025 = vmatpush3.bf16.msra.mxu0 %v1235_v45  ;;  %2037 = vmatpush3.bf16.msra.mxu1 %v1286_v33  ;;  %v1288_v43 = vld [vmem:[#allocation2 + $0x30] sm:$0xff]  ;;  %v1238_v44 = vld [vmem:[#allocation2 + $0x18] sm:$0xff]  ;;  %v1343_v50 = vld [vmem:[#allocation2 + $0x40] sm:$0xff] }
 0x253   :  { %2026 = vmatprep.subr.bf16.mxu0 %v2288_v40  ;;  %2038 = vmatprep.subr.bf16.mxu1 %v2288_v40  ;;  %v1289_v49 = vld [vmem:[#allocation2 + $0x38] sm:$0xff]  ;;  %v1398_v46 = vld [vmem:[#allocation2 + $0x60] sm:$0xff]  ;;  %v1344_v51 = vld [vmem:[#allocation2 + $0x48] sm:$0xff] }
 0x254   :  { %v1399_v52 = vld [vmem:[#allocation2 + $0x68] sm:$0xff]  ;;  %v1346_v38 = vld [vmem:[#allocation2 + $0x58] sm:$0xff] }
 0x255   :  { %v1401_v54 = vld [vmem:[#allocation2 + $0x78] sm:$0xff] }
 0x256   :  { %2027 = vmatpush3.bf16.msra.mxu0 %v1236_v34  ;;  %2039 = vmatpush3.bf16.msra.mxu1 %v1287_v39 }
 0x257   :  { %2028 = vmatprep.subr.bf16.mxu0 %v2288_v40  ;;  %2040 = vmatprep.subr.bf16.mxu1 %v2288_v40 }
 0x25a   :  { %2029 = vmatpush3.bf16.msra.mxu0 %v1237_v42  ;;  %2041 = vmatpush3.bf16.msra.mxu1 %v1288_v43 }
 0x25b   :  { %2030 = vmatprep.subr.bf16.mxu0 %v2288_v40  ;;  %2042 = vmatprep.subr.bf16.mxu1 %v2288_v40 }
 0x25e   :  { %2031 = vmatpush3.bf16.msra.mxu0 %v1238_v44  ;;  %2043 = vmatpush3.bf16.msra.mxu1 %v1289_v49  ;;  %v1445_v44 = vrot.slane %v2574_v57, 3  ;;  %v1393_v49 = vrot.slane %v2579_v58, 2 }
 0x25f   :  { %2048 = vmatprep.subr.bf16.mxu0 %v2288_v40  ;;  %2060 = vmatprep.subr.bf16.mxu1 %v2288_v40 }
 0x261   :  { %2033 = vmatmul.mubr.msk.bf16.vlgmr.msra.gmra.mrb[24].mxu0 %vm472_vm2, %v2687_v35  ;;  %2045 = vmatmul.mubr.msk.bf16.vlgmr.msra.gmra.mrb[24].mxu1 %vm472_vm2, %v2689_v36  ;;  %v1345_v35 = vld [vmem:[#allocation2 + $0x50] sm:$0xff] }
 0x262   :  { %2049 = vmatpush3.bf16.msra.mxu0 %v1343_v50  ;;  %2061 = vmatpush3.bf16.msra.mxu1 %v1398_v46  ;;  %v1400_v36 = vld [vmem:[#allocation2 + $0x70] sm:$0xff]  ;;  %v1448_v50 = vrot.slane %v2579_v58, 3 }
 0x263   :  { %2050 = vmatprep.subr.bf16.mxu0 %v2288_v40  ;;  %2062 = vmatprep.subr.bf16.mxu1 %v2288_v40 }
 0x264   :  { %2056 = vmatprep.mubr.msk.bf16.mxu0 %vm2289_vm1, %v2288_v40  ;;  %2068 = vmatprep.mubr.msk.bf16.mxu1 %vm2289_vm1, %v2288_v40 }
 0x266   :  { %2051 = vmatpush3.bf16.msra.mxu0 %v1344_v51  ;;  %2063 = vmatpush3.bf16.msra.mxu1 %v1399_v52 }
 0x267   :  { %2052 = vmatprep.subr.bf16.mxu0 %v2288_v40  ;;  %2064 = vmatprep.subr.bf16.mxu1 %v2288_v40 }
 0x26a   :  { %2053 = vmatpush3.bf16.msra.mxu0 %v1345_v35  ;;  %2065 = vmatpush3.bf16.msra.mxu1 %v1400_v36 }
 0x26b   :  { %2054 = vmatprep.subr.bf16.mxu0 %v2288_v40  ;;  %2066 = vmatprep.subr.bf16.mxu1 %v2288_v40 }
 0x26e   :  { %2055 = vmatpush3.bf16.msra.mxu0 %v1346_v38  ;;  %2067 = vmatpush3.bf16.msra.mxu1 %v1401_v54 }
 0x26f   :  { %2072 = vmatprep.subr.bf16.mxu0 %v2288_v40  ;;  %2092 = vmatprep.subr.bf16.mxu1 %v2288_v40 }
 0x271   :  { %2057 = vmatmul.mubr.msk.bf16.vlgmr.msra.gmra.mrb[28].mxu0 %vm472_vm2, %v2691_v55  ;;  %2069 = vmatmul.mubr.msk.bf16.vlgmr.msra.gmra.mrb[28].mxu1 %vm472_vm2, %v2693_v37  ;;  %v1390_v37 = vrot.slane %v2574_v57, 2 }
 0x334   :  { %v1276_v41 = vpop.f32.mrb[24].mxu0  ;;  %v1327_v59 = vpop.f32.mrb[24].mxu1 }
 0x335   :  { %v1282_v60 = vmul.f32 %v1276_v41, %v2574_v57  ;;  %v1336_v61 = vmul.f32 %v1334_v53, %v1327_v59  ;;  %v2034_v62 = vpop.f32.mrb[25].mxu0  ;;  %v2046_v45 = vpop.f32.mrb[25].mxu1 }
 0x336   :  { %v1279_v33 = vpop.f32.mrb[26].mxu0  ;;  %v1330_v34 = vpop.f32.mrb[26].mxu1 }
 0x337   :  { %v1283_v39 = vadd.f32 %v1282_v60, %v2579_v58  ;;  %v1340_v42 = vadd.f32 %v1338_v56, %v1336_v61  ;;  %v2035_v55 = vpop.f32.mrb[27].mxu0  ;;  %v2047_v43 = vpop.f32.mrb[27].mxu1 }
 0x339   :  { %1284 = vst [vmem:[%s2858_s7] sm:$0x1] %v1283_v39  ;;  %1341 = vst [vmem:[%s2858_s7 + $0x1] sm:$0x1] %v1340_v42 }
 0x344   :  { %v1384_v46 = vpop.f32.mrb[28].mxu0  ;;  %v1439_v51 = vpop.f32.mrb[28].mxu1 }
 0x345   :  { %v1392_v52 = vmul.f32 %v1390_v37, %v1384_v46  ;;  %v1447_v35 = vmul.f32 %v1445_v44, %v1439_v51  ;;  %v2058_v36 = vpop.f32.mrb[29].mxu0  ;;  %v2070_v38 = vpop.f32.mrb[29].mxu1 }
 0x346   :  { %v1387_v54 = vpop.f32.mrb[30].mxu0  ;;  %v1442_v53 = vpop.f32.mrb[30].mxu1 }
 0x347   :  { %v1395_v56 = vadd.f32 %v1393_v49, %v1392_v52  ;;  %v1450_v41 = vadd.f32 %v1448_v50, %v1447_v35  ;;  %v2059_v59 = vpop.f32.mrb[31].mxu0  ;;  %v2071_v60 = vpop.f32.mrb[31].mxu1 }
 0x349   :  { %1396 = vst [vmem:[%s2858_s7 + $0x2] sm:$0x1] %v1395_v56  ;;  %1451 = vst [vmem:[%s2858_s7 + $0x3] sm:$0x1] %v1450_v41 }
 0x34a   :  { %2280 = dma.done.wait [#allocation4 + $0x1], 4096 }
 0x34b   :  { %2281 = vsyncadd [#allocation4 + $0x1], 4294963200  ;;  %2073 = vmatpush3.bf16.msra.mxu0 %v2369_v0  ;;  %2093 = vmatpush3.bf16.msra.mxu1 %v2409_v8  ;;  %v1504_v0 = vrot.slane %v2574_v57, 4 }
 0x34c   :  { %2074 = vmatprep.subr.bf16.mxu0 %v2288_v40  ;;  %2094 = vmatprep.subr.bf16.mxu1 %v2288_v40 }
 0x34d   :  { %2088 = vmatprep.mubr.msk.bf16.mxu0 %vm2289_vm1, %v2288_v40  ;;  %2108 = vmatprep.mubr.msk.bf16.mxu1 %vm2289_vm1, %v2288_v40 }
 0x34f   :  { %2075 = vmatpush3.bf16.msra.mxu0 %v2374_v1  ;;  %2095 = vmatpush3.bf16.msra.mxu1 %v2414_v9  ;;  %v1560_v1 = vrot.slane %v2574_v57, 5 }
 0x350   :  { %2076 = vmatprep.subr.bf16.mxu0 %v2288_v40  ;;  %2096 = vmatprep.subr.bf16.mxu1 %v2288_v40 }
 0x353   :  { %2077 = vmatpush3.bf16.msra.mxu0 %v2379_v2  ;;  %2097 = vmatpush3.bf16.msra.mxu1 %v2419_v10  ;;  %v1507_v2 = vrot.slane %v2579_v58, 4 }
 0x354   :  { %2078 = vmatprep.subr.bf16.mxu0 %v2288_v40  ;;  %2098 = vmatprep.subr.bf16.mxu1 %v2288_v40 }
 0x357   :  { %2079 = vmatpush3.bf16.msra.mxu0 %v2384_v3  ;;  %2099 = vmatpush3.bf16.msra.mxu1 %v2424_v11  ;;  %v1563_v3 = vrot.slane %v2579_v58, 5 }
 0x358   :  { %2080 = vmatprep.subr.bf16.mxu0 %v2288_v40  ;;  %2100 = vmatprep.subr.bf16.mxu1 %v2288_v40 }
 0x35b   :  { %2081 = vmatpush3.bf16.msra.mxu0 %v2389_v4  ;;  %2101 = vmatpush3.bf16.msra.mxu1 %v2429_v12 }
 0x35c   :  { %2082 = vmatprep.subr.bf16.mxu0 %v2288_v40  ;;  %2102 = vmatprep.subr.bf16.mxu1 %v2288_v40 }
 0x35f   :  { %2083 = vmatpush3.bf16.msra.mxu0 %v2394_v5  ;;  %2103 = vmatpush3.bf16.msra.mxu1 %v2434_v13 }
 0x360   :  { %2084 = vmatprep.subr.bf16.mxu0 %v2288_v40  ;;  %2104 = vmatprep.subr.bf16.mxu1 %v2288_v40 }
 0x363   :  { %2085 = vmatpush3.bf16.msra.mxu0 %v2399_v6  ;;  %2105 = vmatpush3.bf16.msra.mxu1 %v2439_v14 }
 0x364   :  { %2086 = vmatprep.subr.bf16.mxu0 %v2288_v40  ;;  %2106 = vmatprep.subr.bf16.mxu1 %v2288_v40 }
 0x367   :  { %2087 = vmatpush3.bf16.msra.mxu0 %v2404_v7  ;;  %2107 = vmatpush3.bf16.msra.mxu1 %v2444_v15 }
 0x368   :  { %2112 = vmatprep.subr.bf16.mxu0 %v2288_v40  ;;  %2132 = vmatprep.subr.bf16.mxu1 %v2288_v40 }
 0x36a   :  { %2089 = vmatmul.mubr.bf16.vlgmr.msra.gmra.mrb[32].mxu0 %v2695_v47  ;;  %2109 = vmatmul.mubr.bf16.vlgmr.msra.gmra.mrb[32].mxu1 %v2697_v48 }
 0x36b   :  { %2113 = vmatpush3.bf16.msra.mxu0 %v2449_v16  ;;  %2133 = vmatpush3.bf16.msra.mxu1 %v2489_v24  ;;  %v1616_v16 = vrot.slane %v2574_v57, 6 }
 0x36c   :  { %2114 = vmatprep.subr.bf16.mxu0 %v2288_v40  ;;  %2134 = vmatprep.subr.bf16.mxu1 %v2288_v40 }
 0x36d   :  { %2128 = vmatprep.mubr.msk.bf16.mxu0 %vm2289_vm1, %v2288_v40  ;;  %2148 = vmatprep.mubr.msk.bf16.mxu1 %vm2289_vm1, %v2288_v40 }
 0x36f   :  { %2115 = vmatpush3.bf16.msra.mxu0 %v2454_v17  ;;  %2135 = vmatpush3.bf16.msra.mxu1 %v2494_v25  ;;  %v1672_v17 = vrot.slane %v2574_v57, 7 }
 0x370   :  { %2116 = vmatprep.subr.bf16.mxu0 %v2288_v40  ;;  %2136 = vmatprep.subr.bf16.mxu1 %v2288_v40 }
 0x373   :  { %2117 = vmatpush3.bf16.msra.mxu0 %v2459_v18  ;;  %2137 = vmatpush3.bf16.msra.mxu1 %v2499_v26  ;;  %v1619_v18 = vrot.slane %v2579_v58, 6 }
 0x374   :  { %2118 = vmatprep.subr.bf16.mxu0 %v2288_v40  ;;  %2138 = vmatprep.subr.bf16.mxu1 %v2288_v40 }
 0x377   :  { %2119 = vmatpush3.bf16.msra.mxu0 %v2464_v19  ;;  %2139 = vmatpush3.bf16.msra.mxu1 %v2504_v27  ;;  %v1675_v19 = vrot.slane %v2579_v58, 7 }
 0x378   :  { %2120 = vmatprep.subr.bf16.mxu0 %v2288_v40  ;;  %2140 = vmatprep.subr.bf16.mxu1 %v2288_v40 }
 0x37b   :  { %2121 = vmatpush3.bf16.msra.mxu0 %v2469_v20  ;;  %2141 = vmatpush3.bf16.msra.mxu1 %v2509_v28 }
 0x37c   :  { %2122 = vmatprep.subr.bf16.mxu0 %v2288_v40  ;;  %2142 = vmatprep.subr.bf16.mxu1 %v2288_v40 }
 0x37f   :  { %2123 = vmatpush3.bf16.msra.mxu0 %v2474_v21  ;;  %2143 = vmatpush3.bf16.msra.mxu1 %v2514_v29 }
 0x380   :  { %2124 = vmatprep.subr.bf16.mxu0 %v2288_v40  ;;  %2144 = vmatprep.subr.bf16.mxu1 %v2288_v40 }
 0x383   :  { %2125 = vmatpush3.bf16.msra.mxu0 %v2479_v22  ;;  %2145 = vmatpush3.bf16.msra.mxu1 %v2519_v30 }
 0x384   :  { %2126 = vmatprep.subr.bf16.mxu0 %v2288_v40  ;;  %2146 = vmatprep.subr.bf16.mxu1 %v2288_v40 }
 0x387   :  { %2127 = vmatpush3.bf16.msra.mxu0 %v2484_v23  ;;  %2147 = vmatpush3.bf16.msra.mxu1 %v2524_v31 }
 0x38a   :  { %2129 = vmatmul.mubr.bf16.vlgmr.msra.gmra.mrb[36].mxu0 %v2699_v63  ;;  %2149 = vmatmul.mubr.bf16.vlgmr.msra.gmra.mrb[36].mxu1 %v2701_v32 }
 0x43d   :  { %v1498_v4 = vpop.f32.mrb[32].mxu0  ;;  %v1554_v5 = vpop.f32.mrb[32].mxu1 }
 0x43e   :  { %v1506_v6 = vmul.f32 %v1504_v0, %v1498_v4  ;;  %v1562_v7 = vmul.f32 %v1560_v1, %v1554_v5  ;;  %v2090_v8 = vpop.f32.mrb[33].mxu0  ;;  %v2110_v9 = vpop.f32.mrb[33].mxu1 }
 0x43f   :  { %v1501_v10 = vpop.f32.mrb[34].mxu0  ;;  %v1557_v11 = vpop.f32.mrb[34].mxu1 }
 0x440   :  { %v1509_v12 = vadd.f32 %v1507_v2, %v1506_v6  ;;  %v1565_v13 = vadd.f32 %v1563_v3, %v1562_v7  ;;  %v2091_v14 = vpop.f32.mrb[35].mxu0  ;;  %v2111_v15 = vpop.f32.mrb[35].mxu1 }
 0x442   :  { %1510 = vst [vmem:[%s2858_s7 + $0x4] sm:$0x1] %v1509_v12  ;;  %1566 = vst [vmem:[%s2858_s7 + $0x5] sm:$0x1] %v1565_v13 }
 0x45d   :  { %v1610_v20 = vpop.f32.mrb[36].mxu0  ;;  %v1666_v21 = vpop.f32.mrb[36].mxu1 }
 0x45e   :  { %v1618_v22 = vmul.f32 %v1616_v16, %v1610_v20  ;;  %v1674_v23 = vmul.f32 %v1672_v17, %v1666_v21  ;;  %v2130_v24 = vpop.f32.mrb[37].mxu0  ;;  %v2150_v25 = vpop.f32.mrb[37].mxu1 }
 0x45f   :  { %v1613_v26 = vpop.f32.mrb[38].mxu0  ;;  %v1669_v27 = vpop.f32.mrb[38].mxu1 }
 0x460   :  { %v1621_v28 = vadd.f32 %v1619_v18, %v1618_v22  ;;  %v1677_v29 = vadd.f32 %v1675_v19, %v1674_v23  ;;  %v2131_v30 = vpop.f32.mrb[39].mxu0  ;;  %v2151_v31 = vpop.f32.mrb[39].mxu1 }
 0x462   :  { %1622 = vst [vmem:[%s2858_s7 + $0x6] sm:$0x1] %v1621_v28  ;;  %1678 = vst [vmem:[%s2858_s7 + $0x7] sm:$0x1] %v1677_v29 }
 0x463   :  { %1683 = vsyncpa [#allocation6], 1 }
 0x464   :  { %1684 = vsyncpa [#allocation8], 1 }
 0x465   :  { %1685 = vsyncmov [#allocation4] }
 0x468   :  { %s1686_s25 = vpop.sfrf %1685 }
 0x469   :  { %p1782_p10 = scmp.ne.s32.totalorder %s1686_s25, 0 }
 0x46b   :  { %1690 = shalt.err (%p1782_p10)  }
 0x46c   :  { %1692 = vsyncmov [#allocation4 + $0x1] }
 0x46f   :  { %s1693_s26 = vpop.sfrf %1692 }
 0x470   :  { %p1783_p11 = scmp.ne.s32.totalorder %s1693_s26, 0 }
 0x472   :  { %1697 = shalt.err (%p1783_p11)  }

</bundles_post_ra>
